<compile_context>
chip_gen: v7x
topology: tpu7x:2x2x1
jax: 0.10.0
libtpu: 0.0.40
codegen_flags: <defaults>
</compile_context>

<pallas_src>
import functools

import jax
import jax.numpy as jnp
from jax.experimental import pallas as pl
from jax.experimental.pallas import tpu as pltpu

LN_EPS = 1e-5        # torch.nn.LayerNorm default eps
MASK_FILL = -1e30    # masked_softmax fill value
# TODO(synk): ptrseq's exact masked_softmax variant (fill-then-softmax vs.
#             multiply-renormalize) was not available; the fill-then-softmax
#             (where-fill) form is implemented, matching the reference below.


def contextual_attention_kernel(
    # inputs
    xq_ref, xkv_ref, ctx_ref, qmask_ref, kmask_ref,
    wq_ref, wk_ref, wv_ref, wu_ref, bu_ref,
    pool_ref, expand_ref, qg_ref, qb_ref, kg_ref, kb_ref,
    # output
    o_ref,
    # scratch (persists across grid steps)
    kn_scr, vb_scr, hcat_scr,
    *, num_heads, residual):
    bf16 = jnp.bfloat16
    f32 = jnp.float32
    E = xq_ref.shape[-1]
    hs = E // num_heads

    def head_layernorm(z, gamma, beta):
        """Per-head LayerNorm for all heads at once.

        Segment means/vars via a factorized pooling matmul (T,E)@(E,H)@(H,E);
        the E**-0.25 kq scaling is already folded into gamma/beta.
        """
        pool = pool_ref[...]                     # (E, H)  f32
        expand = expand_ref[...]                 # (H, E)  f32
        mu = jnp.dot(jnp.dot(z, pool, preferred_element_type=f32), expand,
                     preferred_element_type=f32)
        zc = z - mu
        var = jnp.dot(jnp.dot(zc * zc, pool, preferred_element_type=f32), expand,
                      preferred_element_type=f32)
        return zc * jax.lax.rsqrt(var + LN_EPS) * gamma + beta

    # ---- K/V path: once per batch element.  The q-tile axis is the innermost
    # ("arbitrary") grid axis, so the persistent VMEM cache stays valid for
    # every qi > 0 of the same batch element.
    @pl.when(pl.program_id(1) == 0)
    def _():
        xkv = jnp.concatenate([xkv_ref[0], ctx_ref[0]], axis=0)        # (Tkv,E) bf16
        k = jnp.dot(xkv, wk_ref[...], preferred_element_type=f32)      # (Tkv,E) f32
        v = jnp.dot(xkv, wv_ref[...], preferred_element_type=f32)      # (Tkv,E) f32
        kn_scr[...] = head_layernorm(k, kg_ref[...], kb_ref[...]).astype(bf16)
        vb_scr[...] = v.astype(bf16)

    # ---- query path (per q tile)
    xq = xq_ref[0]                                                     # (tq,E) bf16
    q = jnp.dot(xq, wq_ref[...], preferred_element_type=f32)           # (tq,E) f32
    qn = head_layernorm(q, qg_ref[...], qb_ref[...]).astype(bf16)

    kn = kn_scr[...]                                                   # (Tkv,E) bf16
    vb = vb_scr[...]                                                   # (Tkv,E) bf16

    # mask predicate hoisted out of the head loop; where-fill matches the
    # reference masked_softmax exactly (including fully-masked query rows).
    amask = (qmask_ref[0] * kmask_ref[0]) > 0.0                        # (tq,Tkv) bool

    # TODO(synk): with production hs (multiple of 128) the per-head lane slices
    #             below are unmasked views; for very long Tkv on v7x (64 MiB
    #             VMEM) an inner kv-block loop with online softmax would be
    #             needed to bound VMEM.
    for h in range(num_heads):                                         # static loop
        sl = slice(h * hs, (h + 1) * hs)
        qh = qn[:, sl]                                                 # (tq, hs)
        kh = kn[:, sl]                                                 # (Tkv, hs)
        vh = vb[:, sl]                                                 # (Tkv, hs)

        s = jax.lax.dot_general(qh, kh, (((1,), (1,)), ((), ())),
                                preferred_element_type=f32)            # (tq, Tkv)
        s = jnp.where(amask, s, MASK_FILL)
        p = jnp.exp(s - jnp.max(s, axis=-1, keepdims=True))            # f32 (EUP)
        l = jnp.sum(p, axis=-1, keepdims=True)                         # (tq, 1)

        oh = jnp.dot(p.astype(bf16), vh, preferred_element_type=f32)   # (tq, hs)
        # deferred softmax normalization: scale the (tq,hs) head output instead
        # of the (tq,Tkv) probability matrix; reciprocal uses the EUP slot.
        oh = oh * pl.reciprocal(l, approx=True)
        hcat_scr[:, sl] = oh.astype(bf16)

    # single full-contraction-depth unify_heads matmul
    out = jnp.dot(hcat_scr[...], wu_ref[...],
                  preferred_element_type=f32) + bu_ref[...]
    if residual:                                                       # static bool
        out = out + xq.astype(f32)
    o_ref[0] = out


def _vmem_limit_bytes(Tq, Tc, E, q_block, num_heads):
    """Derive a per-generation VMEM limit from the actual block sizes."""
    Tkv = Tq + Tc
    bf, f32 = 2, 4
    need = (
        2 * (q_block * E + Tq * E + Tc * E) * bf      # x / context blocks (dbl-buf)
        + 2 * (q_block + Tkv) * f32                   # mask blocks
        + 2 * (4 * E * E) * bf                        # projection / unify weights
        + 2 * (5 * E + 2 * E * num_heads) * f32       # bias / LN / pooling params
        + 2 * (q_block * E) * f32                     # output block
        + (2 * Tkv * E + q_block * E) * bf            # persistent scratch
        + 3 * Tkv * E * f32                           # K/V f32 temporaries
        + 4 * q_block * Tkv * f32                     # score temporaries
    )
    need = int(need * 1.5) + (4 << 20)
    try:
        cap = int(getattr(pltpu.get_tpu_info(), "vmem_capacity_bytes", 64 << 20))
    except Exception:
        cap = 64 << 20
    return max(32 << 20, min(need, int(0.75 * cap)))


def contextual_attention(x, context, params, *, num_heads,
                         mask=None, context_mask=None, residual=False,
                         q_block=None):
    B, Tq, E = x.shape
    Bc, Tc, Ec = context.shape
    assert B == Bc and E == Ec and E % num_heads == 0
    hs = E // num_heads
    Tkv = Tq + Tc

    # Query-tile size: bounds VMEM for long sequences; with the cached K/V path
    # q tiling is ~free.  Default covers the whole sequence for short Tq.
    if q_block is None:
        q_block = 256 if (Tq > 256 and Tq % 256 == 0) else Tq
    assert Tq % q_block == 0
    # bf16 sublane packing: q tiles must be 16-row aligned unless they cover Tq
    assert q_block == Tq or q_block % 16 == 0

    # process_input: default masks are all-ones
    if mask is None:
        mask = jnp.ones((B, Tq), jnp.float32)
    if context_mask is None:
        context_mask = jnp.ones((B, Tc), jnp.float32)
    key_mask = jnp.concatenate(
        [mask.astype(jnp.float32), context_mask.astype(jnp.float32)], axis=1)
    qmask3 = mask.astype(jnp.float32)[:, :, None]                  # (B, Tq, 1)
    kmask3 = key_mask[:, None, :]                                  # (B, 1, Tkv)

    # Fold embedding_dim**(-1/4) into the per-head LN affine params and tile
    # them lane-dense across heads (applied to the full (T, E) tensors).
    scale = float(E) ** -0.25

    def tile_ln(p):
        return jnp.tile(p.astype(jnp.float32) * scale, num_heads).reshape(1, E)

    qg, qb_ = tile_ln(params["qln_w"]), tile_ln(params["qln_b"])
    kg, kb_ = tile_ln(params["kln_w"]), tile_ln(params["kln_b"])

    # Factorized per-head pooling matrices for the LN statistics.
    pool = jnp.kron(jnp.eye(num_heads, dtype=jnp.float32),
                    jnp.full((hs, 1), 1.0 / hs, jnp.float32))      # (E, H)
    expand = jnp.kron(jnp.eye(num_heads, dtype=jnp.float32),
                      jnp.ones((1, hs), jnp.float32))              # (H, E)

    bf16 = jnp.bfloat16
    # Pre-transpose so every in-kernel dot is a plain (M,K)x(K,N) contraction.
    wq_t = jnp.transpose(params["wq"]).astype(bf16)
    wk_t = jnp.transpose(params["wk"]).astype(bf16)
    wv_t = jnp.transpose(params["wv"]).astype(bf16)
    wu_t = jnp.transpose(params["wu"]).astype(bf16)
    bu = params["bu"].astype(jnp.float32).reshape(1, E)

    xb = x.astype(bf16)
    cb = context.astype(bf16)

    kernel = functools.partial(contextual_attention_kernel,
                               num_heads=num_heads, residual=bool(residual))

    grid = (B, Tq // q_block)

    def const2(shape):
        return pl.BlockSpec(shape, lambda b, qi: (0, 0))

    out = pl.pallas_call(
        kernel,
        out_shape=jax.ShapeDtypeStruct((B, Tq, E), jnp.float32),
        grid=grid,
        in_specs=[
            pl.BlockSpec((1, q_block, E), lambda b, qi: (b, qi, 0)),  # x (queries)
            pl.BlockSpec((1, Tq, E), lambda b, qi: (b, 0, 0)),        # x (keys/vals)
            pl.BlockSpec((1, Tc, E), lambda b, qi: (b, 0, 0)),        # context
            pl.BlockSpec((1, q_block, 1), lambda b, qi: (b, qi, 0)),  # query mask
            pl.BlockSpec((1, 1, Tkv), lambda b, qi: (b, 0, 0)),       # key mask
            const2((E, E)),              # to_queries weight^T (bf16)
            const2((E, E)),              # to_keys weight^T    (bf16)
            const2((E, E)),              # to_values weight^T  (bf16)
            const2((E, E)),              # unify_heads weight^T (bf16)
            const2((1, E)),              # unify_heads bias
            const2((E, num_heads)),      # LN pooling matrix
            const2((num_heads, E)),      # LN expand matrix
            const2((1, E)),              # qln gamma (scaled, tiled)
            const2((1, E)),              # qln beta
            const2((1, E)),              # kln gamma
            const2((1, E)),              # kln beta
        ],
        out_specs=pl.BlockSpec((1, q_block, E), lambda b, qi: (b, qi, 0)),
        scratch_shapes=[
            pltpu.VMEM((Tkv, E), bf16),      # cached LayerNormed keys
            pltpu.VMEM((Tkv, E), bf16),      # cached values
            pltpu.VMEM((q_block, E), bf16),  # per-head output assembly
        ],
        compiler_params=pltpu.CompilerParams(
            # batch axis feeds both TCs; the q-tile axis must stay sequential
            # so the cached K/V scratch is reused instead of recomputed.
            dimension_semantics=("parallel", "arbitrary"),
            vmem_limit_bytes=_vmem_limit_bytes(Tq, Tc, E, q_block, num_heads)),
    )(xb, xb, cb, qmask3, kmask3,
      wq_t, wk_t, wv_t, wu_t, bu, pool, expand, qg, qb_, kg, kb_)
    return out


def reference(x, context, params, *, num_heads,
              mask=None, context_mask=None, residual=False):
    """Pure-JAX f32 reference mirroring the PyTorch forward semantics."""
    B, Tq, E = x.shape
    Tc = context.shape[1]
    hs = E // num_heads
    if mask is None:
        mask = jnp.ones((B, Tq), jnp.float32)
    if context_mask is None:
        context_mask = jnp.ones((B, Tc), jnp.float32)
    xkv = jnp.concatenate([x, context], axis=1)
    q = x @ params["wq"].T
    k = xkv @ params["wk"].T
    v = xkv @ params["wv"].T
    q = q.reshape(B, Tq, num_heads, hs)
    k = k.reshape(B, Tq + Tc, num_heads, hs)
    v = v.reshape(B, Tq + Tc, num_heads, hs)

    def ln(z, w, b):
        mu = z.mean(-1, keepdims=True)
        var = ((z - mu) ** 2).mean(-1, keepdims=True)
        return (z - mu) / jnp.sqrt(var + LN_EPS) * w + b

    q = ln(q, params["qln_w"], params["qln_b"]) / E ** 0.25
    k = ln(k, params["kln_w"], params["kln_b"]) / E ** 0.25
    scores = jnp.einsum("bqhd,bkhd->bhqk", q, k)
    key_mask = jnp.concatenate([mask, context_mask], axis=1)
    amask = mask[:, :, None] * key_mask[:, None, :]
    scores = jnp.where(amask[:, None] > 0, scores, MASK_FILL)
    attn = jax.nn.softmax(scores, axis=-1)
    out = jnp.einsum("bhqk,bkhd->bqhd", attn, v).reshape(B, Tq, E)
    out = out @ params["wu"].T + params["bu"]
    return out + x * (1.0 if residual else 0.0)


def init_params(key, embedding_dim, num_heads):
    hs = embedding_dim // num_heads
    ks = jax.random.split(key, 8)
    s = 0.1
    return {
        "wq": s * jax.random.normal(ks[0], (embedding_dim, embedding_dim), jnp.float32),
        "wk": s * jax.random.normal(ks[1], (embedding_dim, embedding_dim), jnp.float32),
        "wv": s * jax.random.normal(ks[2], (embedding_dim, embedding_dim), jnp.float32),
        "wu": s * jax.random.normal(ks[3], (embedding_dim, embedding_dim), jnp.float32),
        "bu": s * jax.random.normal(ks[4], (embedding_dim,), jnp.float32),
        "qln_w": 1.0 + s * jax.random.normal(ks[5], (hs,), jnp.float32),
        "qln_b": s * jax.random.normal(ks[6], (hs,), jnp.float32),
        "kln_w": 1.0 + s * jax.random.normal(ks[7], (hs,), jnp.float32),
        "kln_b": jnp.zeros((hs,), jnp.float32),
    }


if __name__ == "__main__":
    B, Tq, Tc, E, H = 2, 32, 16, 32, 4

    key = jax.random.PRNGKey(0)
    kx, kc, kp = jax.random.split(key, 3)
    x = jax.random.normal(kx, (B, Tq, E), jnp.float32)
    context = jax.random.normal(kc, (B, Tc, E), jnp.float32)
    params = init_params(kp, E, H)

    # mask the last query token of batch 0 and the last context token everywhere
    mask = jnp.ones((B, Tq), jnp.float32).at[0, -1].set(0.0)
    context_mask = jnp.ones((B, Tc), jnp.float32).at[:, -1].set(0.0)

    # q_block=16 < Tq exercises the once-per-batch K/V cache across q tiles.
    out = contextual_attention(x, context, params, num_heads=H,
                               mask=mask, context_mask=context_mask,
                               residual=True, q_block=16)
    out = jax.block_until_ready(out)

    ref = reference(x, context, params, num_heads=H,
                    mask=mask, context_mask=context_mask, residual=True)
    assert out.shape == (B, Tq, E)
    err = jnp.max(jnp.abs(out - ref))
    # bf16 inputs / MXU operands + approx reciprocal -> loose tolerance
    assert jnp.allclose(out, ref, rtol=5e-2, atol=5e-2), f"max abs err {err}"
    print("KERNEL_OK")
</pallas_src>

<mosaic_0001>
module attributes {stable_mosaic.version = 11 : i64} {
  func.func @contextual_attention_kernel(%arg0: i32, %arg1: i32, %arg2: memref<1x16x32xbf16, #tpu.memory_space<vmem>>, %arg3: memref<1x32x32xbf16, #tpu.memory_space<vmem>>, %arg4: memref<1x16x32xbf16, #tpu.memory_space<vmem>>, %arg5: memref<1x16x1xf32, #tpu.memory_space<vmem>>, %arg6: memref<1x1x48xf32, #tpu.memory_space<vmem>>, %arg7: memref<32x32xbf16, #tpu.memory_space<vmem>>, %arg8: memref<32x32xbf16, #tpu.memory_space<vmem>>, %arg9: memref<32x32xbf16, #tpu.memory_space<vmem>>, %arg10: memref<32x32xbf16, #tpu.memory_space<vmem>>, %arg11: memref<1x32xf32, #tpu.memory_space<vmem>>, %arg12: memref<32x4xf32, #tpu.memory_space<vmem>>, %arg13: memref<4x32xf32, #tpu.memory_space<vmem>>, %arg14: memref<1x32xf32, #tpu.memory_space<vmem>>, %arg15: memref<1x32xf32, #tpu.memory_space<vmem>>, %arg16: memref<1x32xf32, #tpu.memory_space<vmem>>, %arg17: memref<1x32xf32, #tpu.memory_space<vmem>>, %arg18: memref<1x16x32xf32, #tpu.memory_space<vmem>>, %arg19: memref<48x32xbf16, #tpu.memory_space<vmem>>, %arg20: memref<48x32xbf16, #tpu.memory_space<vmem>>, %arg21: memref<16x32xbf16, #tpu.memory_space<vmem>>) attributes {dimension_semantics = [#tpu.dimension_semantics<parallel>, #tpu.dimension_semantics<arbitrary>], iteration_bounds = array<i64: 2, 2>, scalar_prefetch = 0 : i64, scratch_operands = 3 : i64, tpu.core_type = #tpu.core_type<tc>, window_params = [{transform_indices = @transform_0, window_bounds = array<i64: 1, 16, 32>}, {transform_indices = @transform_1, window_bounds = array<i64: 1, 32, 32>}, {transform_indices = @transform_2, window_bounds = array<i64: 1, 16, 32>}, {transform_indices = @transform_3, window_bounds = array<i64: 1, 16, 1>}, {transform_indices = @transform_4, window_bounds = array<i64: 1, 1, 48>}, {pipeline_mode = #tpu.pipeline_mode<synchronous>, transform_indices = @transform_5, window_bounds = array<i64: 32, 32>}, {pipeline_mode = #tpu.pipeline_mode<synchronous>, transform_indices = @transform_6, window_bounds = array<i64: 32, 32>}, {pipeline_mode = #tpu.pipeline_mode<synchronous>, transform_indices = @transform_7, window_bounds = array<i64: 32, 32>}, {pipeline_mode = #tpu.pipeline_mode<synchronous>, transform_indices = @transform_8, window_bounds = array<i64: 32, 32>}, {pipeline_mode = #tpu.pipeline_mode<synchronous>, transform_indices = @transform_9, window_bounds = array<i64: 1, 32>}, {pipeline_mode = #tpu.pipeline_mode<synchronous>, transform_indices = @transform_10, window_bounds = array<i64: 32, 4>}, {pipeline_mode = #tpu.pipeline_mode<synchronous>, transform_indices = @transform_11, window_bounds = array<i64: 4, 32>}, {pipeline_mode = #tpu.pipeline_mode<synchronous>, transform_indices = @transform_12, window_bounds = array<i64: 1, 32>}, {pipeline_mode = #tpu.pipeline_mode<synchronous>, transform_indices = @transform_13, window_bounds = array<i64: 1, 32>}, {pipeline_mode = #tpu.pipeline_mode<synchronous>, transform_indices = @transform_14, window_bounds = array<i64: 1, 32>}, {pipeline_mode = #tpu.pipeline_mode<synchronous>, transform_indices = @transform_15, window_bounds = array<i64: 1, 32>}, {transform_indices = @transform_16, window_bounds = array<i64: 1, 16, 32>}]} {
    %c0_i32 = arith.constant 0 : i32
    %0 = arith.cmpi eq, %arg1, %c0_i32 : i32
    %1 = arith.extui %0 : i1 to i32
    %c0_i32_0 = arith.constant 0 : i32
    %2 = arith.cmpi ne, %1, %c0_i32_0 : i32
    scf.if %2 {
      %c0_64 = arith.constant 0 : index
      %c0_65 = arith.constant 0 : index
      %c0_66 = arith.constant 0 : index
      %128 = vector.load %arg3[%c0_64, %c0_65, %c0_66] : memref<1x32x32xbf16, #tpu.memory_space<vmem>>, vector<1x32x32xbf16>
      %129 = vector.shape_cast %128 : vector<1x32x32xbf16> to vector<32x32xbf16>
      %c0_67 = arith.constant 0 : index
      %c0_68 = arith.constant 0 : index
      %c0_69 = arith.constant 0 : index
      %130 = vector.load %arg4[%c0_67, %c0_68, %c0_69] : memref<1x16x32xbf16, #tpu.memory_space<vmem>>, vector<1x16x32xbf16>
      %131 = vector.shape_cast %130 : vector<1x16x32xbf16> to vector<16x32xbf16>
      %132 = tpu.concatenate %129, %131 in 0 : vector<32x32xbf16>, vector<16x32xbf16> -> vector<48x32xbf16>
      %c0_70 = arith.constant 0 : index
      %c0_71 = arith.constant 0 : index
      %133 = vector.load %arg8[%c0_70, %c0_71] : memref<32x32xbf16, #tpu.memory_space<vmem>>, vector<32x32xbf16>
      %cst_72 = arith.constant dense<0.000000e+00> : vector<48x32xf32>
      %134 = tpu.matmul %132, %133, %cst_72 {dimension_numbers = #tpu.dot_dimension_numbers<[1], [0], [0], [1], [0, 0, 1, 1], [], []>} : vector<48x32xbf16>, vector<32x32xbf16>, vector<48x32xf32> -> vector<48x32xf32>
      %c0_73 = arith.constant 0 : index
      %c0_74 = arith.constant 0 : index
      %135 = vector.load %arg9[%c0_73, %c0_74] : memref<32x32xbf16, #tpu.memory_space<vmem>>, vector<32x32xbf16>
      %cst_75 = arith.constant dense<0.000000e+00> : vector<48x32xf32>
      %136 = tpu.matmul %132, %135, %cst_75 {dimension_numbers = #tpu.dot_dimension_numbers<[1], [0], [0], [1], [0, 0, 1, 1], [], []>} : vector<48x32xbf16>, vector<32x32xbf16>, vector<48x32xf32> -> vector<48x32xf32>
      %c0_76 = arith.constant 0 : index
      %c0_77 = arith.constant 0 : index
      %137 = vector.load %arg16[%c0_76, %c0_77] : memref<1x32xf32, #tpu.memory_space<vmem>>, vector<1x32xf32>
      %c0_78 = arith.constant 0 : index
      %c0_79 = arith.constant 0 : index
      %138 = vector.load %arg17[%c0_78, %c0_79] : memref<1x32xf32, #tpu.memory_space<vmem>>, vector<1x32xf32>
      %c0_80 = arith.constant 0 : index
      %c0_81 = arith.constant 0 : index
      %139 = vector.load %arg12[%c0_80, %c0_81] : memref<32x4xf32, #tpu.memory_space<vmem>>, vector<32x4xf32>
      %c0_82 = arith.constant 0 : index
      %c0_83 = arith.constant 0 : index
      %140 = vector.load %arg13[%c0_82, %c0_83] : memref<4x32xf32, #tpu.memory_space<vmem>>, vector<4x32xf32>
      %cst_84 = arith.constant dense<0.000000e+00> : vector<48x4xf32>
      %141 = tpu.matmul %134, %139, %cst_84 {dimension_numbers = #tpu.dot_dimension_numbers<[1], [0], [0], [1], [0, 0, 1, 1], [], []>} : vector<48x32xf32>, vector<32x4xf32>, vector<48x4xf32> -> vector<48x4xf32>
      %cst_85 = arith.constant dense<0.000000e+00> : vector<48x32xf32>
      %142 = tpu.matmul %141, %140, %cst_85 {dimension_numbers = #tpu.dot_dimension_numbers<[1], [0], [0], [1], [0, 0, 1, 1], [], []>} : vector<48x4xf32>, vector<4x32xf32>, vector<48x32xf32> -> vector<48x32xf32>
      %143 = arith.subf %134, %142 : vector<48x32xf32>
      %144 = arith.mulf %143, %143 : vector<48x32xf32>
      %cst_86 = arith.constant dense<0.000000e+00> : vector<48x4xf32>
      %145 = tpu.matmul %144, %139, %cst_86 {dimension_numbers = #tpu.dot_dimension_numbers<[1], [0], [0], [1], [0, 0, 1, 1], [], []>} : vector<48x32xf32>, vector<32x4xf32>, vector<48x4xf32> -> vector<48x4xf32>
      %cst_87 = arith.constant dense<0.000000e+00> : vector<48x32xf32>
      %146 = tpu.matmul %145, %140, %cst_87 {dimension_numbers = #tpu.dot_dimension_numbers<[1], [0], [0], [1], [0, 0, 1, 1], [], []>} : vector<48x4xf32>, vector<4x32xf32>, vector<48x32xf32> -> vector<48x32xf32>
      %cst_88 = arith.constant 9.99999974E-6 : f32
      %147 = vector.broadcast %cst_88 : f32 to vector<48x32xf32>
      %148 = arith.addf %146, %147 : vector<48x32xf32>
      %149 = math.rsqrt %148 : vector<48x32xf32>
      %150 = arith.mulf %143, %149 : vector<48x32xf32>
      %151 = vector.broadcast %137 : vector<1x32xf32> to vector<48x32xf32>
      %152 = arith.mulf %150, %151 : vector<48x32xf32>
      %153 = vector.broadcast %138 : vector<1x32xf32> to vector<48x32xf32>
      %154 = arith.addf %152, %153 : vector<48x32xf32>
      %155 = arith.truncf %154 : vector<48x32xf32> to vector<48x32xbf16>
      %c0_89 = arith.constant 0 : index
      %c0_90 = arith.constant 0 : index
      %156 = vector.load %arg19[%c0_89, %c0_90] : memref<48x32xbf16, #tpu.memory_space<vmem>>, vector<48x32xbf16>
      tpu.vector_store %arg19[%c0_89, %c0_90], %155 {strides = array<i32>} : memref<48x32xbf16, #tpu.memory_space<vmem>>, vector<48x32xbf16>,
      %157 = arith.truncf %136 : vector<48x32xf32> to vector<48x32xbf16>
      %c0_91 = arith.constant 0 : index
      %c0_92 = arith.constant 0 : index
      %158 = vector.load %arg20[%c0_91, %c0_92] : memref<48x32xbf16, #tpu.memory_space<vmem>>, vector<48x32xbf16>
      tpu.vector_store %arg20[%c0_91, %c0_92], %157 {strides = array<i32>} : memref<48x32xbf16, #tpu.memory_space<vmem>>, vector<48x32xbf16>,
    } else {
    }
    %c0 = arith.constant 0 : index
    %c0_1 = arith.constant 0 : index
    %c0_2 = arith.constant 0 : index
    %3 = vector.load %arg2[%c0, %c0_1, %c0_2] : memref<1x16x32xbf16, #tpu.memory_space<vmem>>, vector<1x16x32xbf16>
    %4 = vector.shape_cast %3 : vector<1x16x32xbf16> to vector<16x32xbf16>
    %c0_3 = arith.constant 0 : index
    %c0_4 = arith.constant 0 : index
    %5 = vector.load %arg7[%c0_3, %c0_4] : memref<32x32xbf16, #tpu.memory_space<vmem>>, vector<32x32xbf16>
    %cst = arith.constant dense<0.000000e+00> : vector<16x32xf32>
    %6 = tpu.matmul %4, %5, %cst {dimension_numbers = #tpu.dot_dimension_numbers<[1], [0], [0], [1], [0, 0, 1, 1], [], []>} : vector<16x32xbf16>, vector<32x32xbf16>, vector<16x32xf32> -> vector<16x32xf32>
    %c0_5 = arith.constant 0 : index
    %c0_6 = arith.constant 0 : index
    %7 = vector.load %arg14[%c0_5, %c0_6] : memref<1x32xf32, #tpu.memory_space<vmem>>, vector<1x32xf32>
    %c0_7 = arith.constant 0 : index
    %c0_8 = arith.constant 0 : index
    %8 = vector.load %arg15[%c0_7, %c0_8] : memref<1x32xf32, #tpu.memory_space<vmem>>, vector<1x32xf32>
    %c0_9 = arith.constant 0 : index
    %c0_10 = arith.constant 0 : index
    %9 = vector.load %arg12[%c0_9, %c0_10] : memref<32x4xf32, #tpu.memory_space<vmem>>, vector<32x4xf32>
    %c0_11 = arith.constant 0 : index
    %c0_12 = arith.constant 0 : index
    %10 = vector.load %arg13[%c0_11, %c0_12] : memref<4x32xf32, #tpu.memory_space<vmem>>, vector<4x32xf32>
    %cst_13 = arith.constant dense<0.000000e+00> : vector<16x4xf32>
    %11 = tpu.matmul %6, %9, %cst_13 {dimension_numbers = #tpu.dot_dimension_numbers<[1], [0], [0], [1], [0, 0, 1, 1], [], []>} : vector<16x32xf32>, vector<32x4xf32>, vector<16x4xf32> -> vector<16x4xf32>
    %cst_14 = arith.constant dense<0.000000e+00> : vector<16x32xf32>
    %12 = tpu.matmul %11, %10, %cst_14 {dimension_numbers = #tpu.dot_dimension_numbers<[1], [0], [0], [1], [0, 0, 1, 1], [], []>} : vector<16x4xf32>, vector<4x32xf32>, vector<16x32xf32> -> vector<16x32xf32>
    %13 = arith.subf %6, %12 : vector<16x32xf32>
    %14 = arith.mulf %13, %13 : vector<16x32xf32>
    %cst_15 = arith.constant dense<0.000000e+00> : vector<16x4xf32>
    %15 = tpu.matmul %14, %9, %cst_15 {dimension_numbers = #tpu.dot_dimension_numbers<[1], [0], [0], [1], [0, 0, 1, 1], [], []>} : vector<16x32xf32>, vector<32x4xf32>, vector<16x4xf32> -> vector<16x4xf32>
    %cst_16 = arith.constant dense<0.000000e+00> : vector<16x32xf32>
    %16 = tpu.matmul %15, %10, %cst_16 {dimension_numbers = #tpu.dot_dimension_numbers<[1], [0], [0], [1], [0, 0, 1, 1], [], []>} : vector<16x4xf32>, vector<4x32xf32>, vector<16x32xf32> -> vector<16x32xf32>
    %cst_17 = arith.constant 9.99999974E-6 : f32
    %17 = vector.broadcast %cst_17 : f32 to vector<16x32xf32>
    %18 = arith.addf %16, %17 : vector<16x32xf32>
    %19 = math.rsqrt %18 : vector<16x32xf32>
    %20 = arith.mulf %13, %19 : vector<16x32xf32>
    %21 = vector.broadcast %7 : vector<1x32xf32> to vector<16x32xf32>
    %22 = arith.mulf %20, %21 : vector<16x32xf32>
    %23 = vector.broadcast %8 : vector<1x32xf32> to vector<16x32xf32>
    %24 = arith.addf %22, %23 : vector<16x32xf32>
    %25 = arith.truncf %24 : vector<16x32xf32> to vector<16x32xbf16>
    %c0_18 = arith.constant 0 : index
    %c0_19 = arith.constant 0 : index
    %26 = vector.load %arg19[%c0_18, %c0_19] : memref<48x32xbf16, #tpu.memory_space<vmem>>, vector<48x32xbf16>
    %c0_20 = arith.constant 0 : index
    %c0_21 = arith.constant 0 : index
    %27 = vector.load %arg20[%c0_20, %c0_21] : memref<48x32xbf16, #tpu.memory_space<vmem>>, vector<48x32xbf16>
    %c0_22 = arith.constant 0 : index
    %c0_23 = arith.constant 0 : index
    %c0_24 = arith.constant 0 : index
    %28 = vector.load %arg5[%c0_22, %c0_23, %c0_24] : memref<1x16x1xf32, #tpu.memory_space<vmem>>, vector<1x16x1xf32>
    %29 = vector.shape_cast %28 : vector<1x16x1xf32> to vector<16x1xf32>
    %c0_25 = arith.constant 0 : index
    %c0_26 = arith.constant 0 : index
    %c0_27 = arith.constant 0 : index
    %30 = vector.load %arg6[%c0_25, %c0_26, %c0_27] : memref<1x1x48xf32, #tpu.memory_space<vmem>>, vector<1x1x48xf32>
    %31 = vector.shape_cast %30 : vector<1x1x48xf32> to vector<1x48xf32>
    %32 = vector.broadcast %29 : vector<16x1xf32> to vector<16x48xf32>
    %33 = vector.broadcast %31 : vector<1x48xf32> to vector<16x48xf32>
    %34 = arith.mulf %32, %33 : vector<16x48xf32>
    %cst_28 = arith.constant 0.000000e+00 : f32
    %35 = vector.broadcast %cst_28 : f32 to vector<16x48xf32>
    %36 = arith.cmpf ogt, %34, %35 : vector<16x48xf32>
    %37 = vector.extract_strided_slice %25 {offsets = [0, 0], sizes = [16, 8], strides = [1, 1]} : vector<16x32xbf16> to vector<16x8xbf16>
    %38 = vector.extract_strided_slice %26 {offsets = [0, 0], sizes = [48, 8], strides = [1, 1]} : vector<48x32xbf16> to vector<48x8xbf16>
    %39 = vector.extract_strided_slice %27 {offsets = [0, 0], sizes = [48, 8], strides = [1, 1]} : vector<48x32xbf16> to vector<48x8xbf16>
    %cst_29 = arith.constant dense<0.000000e+00> : vector<16x48xf32>
    %40 = tpu.matmul %37, %38, %cst_29 {dimension_numbers = #tpu.dot_dimension_numbers<[1], [1], [0], [0], [0, 0, 1, 0], [], []>} : vector<16x8xbf16>, vector<48x8xbf16>, vector<16x48xf32> -> vector<16x48xf32>
    %cst_30 = arith.constant -1.000000e+30 : f32
    %41 = vector.broadcast %cst_30 : f32 to vector<16x48xf32>
    %42 = arith.select %36, %40, %41 : vector<16x48xi1>, vector<16x48xf32>
    %cst_31 = arith.constant dense<0xFF800000> : vector<16xf32>
    %43 = vector.multi_reduction <maximumf>, %42, %cst_31 [1] : vector<16x48xf32> to vector<16xf32>
    %44 = vector.shape_cast %43 : vector<16xf32> to vector<16x1xf32>
    %45 = vector.broadcast %44 : vector<16x1xf32> to vector<16x48xf32>
    %46 = arith.subf %42, %45 : vector<16x48xf32>
    %47 = math.exp %46 : vector<16x48xf32>
    %cst_32 = arith.constant dense<0.000000e+00> : vector<16xf32>
    %48 = vector.multi_reduction <add>, %47, %cst_32 [1] : vector<16x48xf32> to vector<16xf32>
    %49 = vector.shape_cast %48 : vector<16xf32> to vector<16x1xf32>
    %50 = arith.truncf %47 : vector<16x48xf32> to vector<16x48xbf16>
    %cst_33 = arith.constant dense<0.000000e+00> : vector<16x8xf32>
    %51 = tpu.matmul %50, %39, %cst_33 {dimension_numbers = #tpu.dot_dimension_numbers<[1], [0], [0], [1], [0, 0, 1, 1], [], []>} : vector<16x48xbf16>, vector<48x8xbf16>, vector<16x8xf32> -> vector<16x8xf32>
    %52 = tpu.reciprocal %49 {approx = true} : vector<16x1xf32> -> vector<16x1xf32>
    %53 = vector.broadcast %52 : vector<16x1xf32> to vector<16x8xf32>
    %54 = arith.mulf %51, %53 : vector<16x8xf32>
    %55 = arith.truncf %54 : vector<16x8xf32> to vector<16x8xbf16>
    %c0_34 = arith.constant 0 : index
    %c0_35 = arith.constant 0 : index
    %56 = vector.load %arg21[%c0_34, %c0_35] : memref<16x32xbf16, #tpu.memory_space<vmem>>, vector<16x8xbf16>
    tpu.vector_store %arg21[%c0_34, %c0_35], %55 {strides = array<i32>} : memref<16x32xbf16, #tpu.memory_space<vmem>>, vector<16x8xbf16>,
    %57 = vector.extract_strided_slice %25 {offsets = [0, 8], sizes = [16, 8], strides = [1, 1]} : vector<16x32xbf16> to vector<16x8xbf16>
    %58 = vector.extract_strided_slice %26 {offsets = [0, 8], sizes = [48, 8], strides = [1, 1]} : vector<48x32xbf16> to vector<48x8xbf16>
    %59 = vector.extract_strided_slice %27 {offsets = [0, 8], sizes = [48, 8], strides = [1, 1]} : vector<48x32xbf16> to vector<48x8xbf16>
    %cst_36 = arith.constant dense<0.000000e+00> : vector<16x48xf32>
    %60 = tpu.matmul %57, %58, %cst_36 {dimension_numbers = #tpu.dot_dimension_numbers<[1], [1], [0], [0], [0, 0, 1, 0], [], []>} : vector<16x8xbf16>, vector<48x8xbf16>, vector<16x48xf32> -> vector<16x48xf32>
    %cst_37 = arith.constant -1.000000e+30 : f32
    %61 = vector.broadcast %cst_37 : f32 to vector<16x48xf32>
    %62 = arith.select %36, %60, %61 : vector<16x48xi1>, vector<16x48xf32>
    %cst_38 = arith.constant dense<0xFF800000> : vector<16xf32>
    %63 = vector.multi_reduction <maximumf>, %62, %cst_38 [1] : vector<16x48xf32> to vector<16xf32>
    %64 = vector.shape_cast %63 : vector<16xf32> to vector<16x1xf32>
    %65 = vector.broadcast %64 : vector<16x1xf32> to vector<16x48xf32>
    %66 = arith.subf %62, %65 : vector<16x48xf32>
    %67 = math.exp %66 : vector<16x48xf32>
    %cst_39 = arith.constant dense<0.000000e+00> : vector<16xf32>
    %68 = vector.multi_reduction <add>, %67, %cst_39 [1] : vector<16x48xf32> to vector<16xf32>
    %69 = vector.shape_cast %68 : vector<16xf32> to vector<16x1xf32>
    %70 = arith.truncf %67 : vector<16x48xf32> to vector<16x48xbf16>
    %cst_40 = arith.constant dense<0.000000e+00> : vector<16x8xf32>
    %71 = tpu.matmul %70, %59, %cst_40 {dimension_numbers = #tpu.dot_dimension_numbers<[1], [0], [0], [1], [0, 0, 1, 1], [], []>} : vector<16x48xbf16>, vector<48x8xbf16>, vector<16x8xf32> -> vector<16x8xf32>
    %72 = tpu.reciprocal %69 {approx = true} : vector<16x1xf32> -> vector<16x1xf32>
    %73 = vector.broadcast %72 : vector<16x1xf32> to vector<16x8xf32>
    %74 = arith.mulf %71, %73 : vector<16x8xf32>
    %75 = arith.truncf %74 : vector<16x8xf32> to vector<16x8xbf16>
    %c0_41 = arith.constant 0 : index
    %c8 = arith.constant 8 : index
    %76 = vector.load %arg21[%c0_41, %c8] : memref<16x32xbf16, #tpu.memory_space<vmem>>, vector<16x8xbf16>
    tpu.vector_store %arg21[%c0_41, %c8], %75 {strides = array<i32>} : memref<16x32xbf16, #tpu.memory_space<vmem>>, vector<16x8xbf16>,
    %77 = vector.extract_strided_slice %25 {offsets = [0, 16], sizes = [16, 8], strides = [1, 1]} : vector<16x32xbf16> to vector<16x8xbf16>
    %78 = vector.extract_strided_slice %26 {offsets = [0, 16], sizes = [48, 8], strides = [1, 1]} : vector<48x32xbf16> to vector<48x8xbf16>
    %79 = vector.extract_strided_slice %27 {offsets = [0, 16], sizes = [48, 8], strides = [1, 1]} : vector<48x32xbf16> to vector<48x8xbf16>
    %cst_42 = arith.constant dense<0.000000e+00> : vector<16x48xf32>
    %80 = tpu.matmul %77, %78, %cst_42 {dimension_numbers = #tpu.dot_dimension_numbers<[1], [1], [0], [0], [0, 0, 1, 0], [], []>} : vector<16x8xbf16>, vector<48x8xbf16>, vector<16x48xf32> -> vector<16x48xf32>
    %cst_43 = arith.constant -1.000000e+30 : f32
    %81 = vector.broadcast %cst_43 : f32 to vector<16x48xf32>
    %82 = arith.select %36, %80, %81 : vector<16x48xi1>, vector<16x48xf32>
    %cst_44 = arith.constant dense<0xFF800000> : vector<16xf32>
    %83 = vector.multi_reduction <maximumf>, %82, %cst_44 [1] : vector<16x48xf32> to vector<16xf32>
    %84 = vector.shape_cast %83 : vector<16xf32> to vector<16x1xf32>
    %85 = vector.broadcast %84 : vector<16x1xf32> to vector<16x48xf32>
    %86 = arith.subf %82, %85 : vector<16x48xf32>
    %87 = math.exp %86 : vector<16x48xf32>
    %cst_45 = arith.constant dense<0.000000e+00> : vector<16xf32>
    %88 = vector.multi_reduction <add>, %87, %cst_45 [1] : vector<16x48xf32> to vector<16xf32>
    %89 = vector.shape_cast %88 : vector<16xf32> to vector<16x1xf32>
    %90 = arith.truncf %87 : vector<16x48xf32> to vector<16x48xbf16>
    %cst_46 = arith.constant dense<0.000000e+00> : vector<16x8xf32>
    %91 = tpu.matmul %90, %79, %cst_46 {dimension_numbers = #tpu.dot_dimension_numbers<[1], [0], [0], [1], [0, 0, 1, 1], [], []>} : vector<16x48xbf16>, vector<48x8xbf16>, vector<16x8xf32> -> vector<16x8xf32>
    %92 = tpu.reciprocal %89 {approx = true} : vector<16x1xf32> -> vector<16x1xf32>
    %93 = vector.broadcast %92 : vector<16x1xf32> to vector<16x8xf32>
    %94 = arith.mulf %91, %93 : vector<16x8xf32>
    %95 = arith.truncf %94 : vector<16x8xf32> to vector<16x8xbf16>
    %c0_47 = arith.constant 0 : index
    %c16 = arith.constant 16 : index
    %96 = vector.load %arg21[%c0_47, %c16] : memref<16x32xbf16, #tpu.memory_space<vmem>>, vector<16x8xbf16>
    tpu.vector_store %arg21[%c0_47, %c16], %95 {strides = array<i32>} : memref<16x32xbf16, #tpu.memory_space<vmem>>, vector<16x8xbf16>,
    %97 = vector.extract_strided_slice %25 {offsets = [0, 24], sizes = [16, 8], strides = [1, 1]} : vector<16x32xbf16> to vector<16x8xbf16>
    %98 = vector.extract_strided_slice %26 {offsets = [0, 24], sizes = [48, 8], strides = [1, 1]} : vector<48x32xbf16> to vector<48x8xbf16>
    %99 = vector.extract_strided_slice %27 {offsets = [0, 24], sizes = [48, 8], strides = [1, 1]} : vector<48x32xbf16> to vector<48x8xbf16>
    %cst_48 = arith.constant dense<0.000000e+00> : vector<16x48xf32>
    %100 = tpu.matmul %97, %98, %cst_48 {dimension_numbers = #tpu.dot_dimension_numbers<[1], [1], [0], [0], [0, 0, 1, 0], [], []>} : vector<16x8xbf16>, vector<48x8xbf16>, vector<16x48xf32> -> vector<16x48xf32>
    %cst_49 = arith.constant -1.000000e+30 : f32
    %101 = vector.broadcast %cst_49 : f32 to vector<16x48xf32>
    %102 = arith.select %36, %100, %101 : vector<16x48xi1>, vector<16x48xf32>
    %cst_50 = arith.constant dense<0xFF800000> : vector<16xf32>
    %103 = vector.multi_reduction <maximumf>, %102, %cst_50 [1] : vector<16x48xf32> to vector<16xf32>
    %104 = vector.shape_cast %103 : vector<16xf32> to vector<16x1xf32>
    %105 = vector.broadcast %104 : vector<16x1xf32> to vector<16x48xf32>
    %106 = arith.subf %102, %105 : vector<16x48xf32>
    %107 = math.exp %106 : vector<16x48xf32>
    %cst_51 = arith.constant dense<0.000000e+00> : vector<16xf32>
    %108 = vector.multi_reduction <add>, %107, %cst_51 [1] : vector<16x48xf32> to vector<16xf32>
    %109 = vector.shape_cast %108 : vector<16xf32> to vector<16x1xf32>
    %110 = arith.truncf %107 : vector<16x48xf32> to vector<16x48xbf16>
    %cst_52 = arith.constant dense<0.000000e+00> : vector<16x8xf32>
    %111 = tpu.matmul %110, %99, %cst_52 {dimension_numbers = #tpu.dot_dimension_numbers<[1], [0], [0], [1], [0, 0, 1, 1], [], []>} : vector<16x48xbf16>, vector<48x8xbf16>, vector<16x8xf32> -> vector<16x8xf32>
    %112 = tpu.reciprocal %109 {approx = true} : vector<16x1xf32> -> vector<16x1xf32>
    %113 = vector.broadcast %112 : vector<16x1xf32> to vector<16x8xf32>
    %114 = arith.mulf %111, %113 : vector<16x8xf32>
    %115 = arith.truncf %114 : vector<16x8xf32> to vector<16x8xbf16>
    %c0_53 = arith.constant 0 : index
    %c24 = arith.constant 24 : index
    %116 = vector.load %arg21[%c0_53, %c24] : memref<16x32xbf16, #tpu.memory_space<vmem>>, vector<16x8xbf16>
    tpu.vector_store %arg21[%c0_53, %c24], %115 {strides = array<i32>} : memref<16x32xbf16, #tpu.memory_space<vmem>>, vector<16x8xbf16>,
    %c0_54 = arith.constant 0 : index
    %c0_55 = arith.constant 0 : index
    %117 = vector.load %arg21[%c0_54, %c0_55] : memref<16x32xbf16, #tpu.memory_space<vmem>>, vector<16x32xbf16>
    %c0_56 = arith.constant 0 : index
    %c0_57 = arith.constant 0 : index
    %118 = vector.load %arg10[%c0_56, %c0_57] : memref<32x32xbf16, #tpu.memory_space<vmem>>, vector<32x32xbf16>
    %cst_58 = arith.constant dense<0.000000e+00> : vector<16x32xf32>
    %119 = tpu.matmul %117, %118, %cst_58 {dimension_numbers = #tpu.dot_dimension_numbers<[1], [0], [0], [1], [0, 0, 1, 1], [], []>} : vector<16x32xbf16>, vector<32x32xbf16>, vector<16x32xf32> -> vector<16x32xf32>
    %c0_59 = arith.constant 0 : index
    %c0_60 = arith.constant 0 : index
    %120 = vector.load %arg11[%c0_59, %c0_60] : memref<1x32xf32, #tpu.memory_space<vmem>>, vector<1x32xf32>
    %121 = vector.broadcast %120 : vector<1x32xf32> to vector<16x32xf32>
    %122 = arith.addf %119, %121 : vector<16x32xf32>
    %123 = arith.extf %4 : vector<16x32xbf16> to vector<16x32xf32>
    %124 = arith.addf %122, %123 : vector<16x32xf32>
    %c0_61 = arith.constant 0 : index
    %c0_62 = arith.constant 0 : index
    %c0_63 = arith.constant 0 : index
    %125 = vector.load %arg18[%c0_61, %c0_62, %c0_63] : memref<1x16x32xf32, #tpu.memory_space<vmem>>, vector<1x16x32xf32>
    %126 = vector.shape_cast %125 : vector<1x16x32xf32> to vector<16x32xf32>
    %127 = vector.shape_cast %124 : vector<16x32xf32> to vector<1x16x32xf32>
    tpu.vector_store %arg18[%c0_61, %c0_62, %c0_63], %127 {strides = array<i32>} : memref<1x16x32xf32, #tpu.memory_space<vmem>>, vector<1x16x32xf32>,
    return
  }
  func.func @transform_0(%arg0: i32, %arg1: i32) -> (i32, i32, i32) {
    %c0_i32 = arith.constant 0 : i32
    %c0_i32_0 = arith.constant 0 : i32
    return %arg0, %arg1, %c0_i32 : i32, i32, i32
  }
  func.func @transform_1(%arg0: i32, %arg1: i32) -> (i32, i32, i32) {
    %c0_i32 = arith.constant 0 : i32
    %c0_i32_0 = arith.constant 0 : i32
    %c0_i32_1 = arith.constant 0 : i32
    return %arg0, %c0_i32, %c0_i32_0 : i32, i32, i32
  }
  func.func @transform_2(%arg0: i32, %arg1: i32) -> (i32, i32, i32) {
    %c0_i32 = arith.constant 0 : i32
    %c0_i32_0 = arith.constant 0 : i32
    %c0_i32_1 = arith.constant 0 : i32
    return %arg0, %c0_i32, %c0_i32_0 : i32, i32, i32
  }
  func.func @transform_3(%arg0: i32, %arg1: i32) -> (i32, i32, i32) {
    %c0_i32 = arith.constant 0 : i32
    %c0_i32_0 = arith.constant 0 : i32
    return %arg0, %arg1, %c0_i32 : i32, i32, i32
  }
  func.func @transform_4(%arg0: i32, %arg1: i32) -> (i32, i32, i32) {
    %c0_i32 = arith.constant 0 : i32
    %c0_i32_0 = arith.constant 0 : i32
    %c0_i32_1 = arith.constant 0 : i32
    return %arg0, %c0_i32, %c0_i32_0 : i32, i32, i32
  }
  func.func @transform_5(%arg0: i32, %arg1: i32) -> (i32, i32) {
    %c0_i32 = arith.constant 0 : i32
    %c0_i32_0 = arith.constant 0 : i32
    %c0_i32_1 = arith.constant 0 : i32
    return %c0_i32, %c0_i32_0 : i32, i32
  }
  func.func @transform_6(%arg0: i32, %arg1: i32) -> (i32, i32) {
    %c0_i32 = arith.constant 0 : i32
    %c0_i32_0 = arith.constant 0 : i32
    %c0_i32_1 = arith.constant 0 : i32
    return %c0_i32, %c0_i32_0 : i32, i32
  }
  func.func @transform_7(%arg0: i32, %arg1: i32) -> (i32, i32) {
    %c0_i32 = arith.constant 0 : i32
    %c0_i32_0 = arith.constant 0 : i32
    %c0_i32_1 = arith.constant 0 : i32
    return %c0_i32, %c0_i32_0 : i32, i32
  }
  func.func @transform_8(%arg0: i32, %arg1: i32) -> (i32, i32) {
    %c0_i32 = arith.constant 0 : i32
    %c0_i32_0 = arith.constant 0 : i32
    %c0_i32_1 = arith.constant 0 : i32
    return %c0_i32, %c0_i32_0 : i32, i32
  }
  func.func @transform_9(%arg0: i32, %arg1: i32) -> (i32, i32) {
    %c0_i32 = arith.constant 0 : i32
    %c0_i32_0 = arith.constant 0 : i32
    %c0_i32_1 = arith.constant 0 : i32
    return %c0_i32, %c0_i32_0 : i32, i32
  }
  func.func @transform_10(%arg0: i32, %arg1: i32) -> (i32, i32) {
    %c0_i32 = arith.constant 0 : i32
    %c0_i32_0 = arith.constant 0 : i32
    %c0_i32_1 = arith.constant 0 : i32
    return %c0_i32, %c0_i32_0 : i32, i32
  }
  func.func @transform_11(%arg0: i32, %arg1: i32) -> (i32, i32) {
    %c0_i32 = arith.constant 0 : i32
    %c0_i32_0 = arith.constant 0 : i32
    %c0_i32_1 = arith.constant 0 : i32
    return %c0_i32, %c0_i32_0 : i32, i32
  }
  func.func @transform_12(%arg0: i32, %arg1: i32) -> (i32, i32) {
    %c0_i32 = arith.constant 0 : i32
    %c0_i32_0 = arith.constant 0 : i32
    %c0_i32_1 = arith.constant 0 : i32
    return %c0_i32, %c0_i32_0 : i32, i32
  }
  func.func @transform_13(%arg0: i32, %arg1: i32) -> (i32, i32) {
    %c0_i32 = arith.constant 0 : i32
    %c0_i32_0 = arith.constant 0 : i32
    %c0_i32_1 = arith.constant 0 : i32
    return %c0_i32, %c0_i32_0 : i32, i32
  }
  func.func @transform_14(%arg0: i32, %arg1: i32) -> (i32, i32) {
    %c0_i32 = arith.constant 0 : i32
    %c0_i32_0 = arith.constant 0 : i32
    %c0_i32_1 = arith.constant 0 : i32
    return %c0_i32, %c0_i32_0 : i32, i32
  }
  func.func @transform_15(%arg0: i32, %arg1: i32) -> (i32, i32) {
    %c0_i32 = arith.constant 0 : i32
    %c0_i32_0 = arith.constant 0 : i32
    %c0_i32_1 = arith.constant 0 : i32
    return %c0_i32, %c0_i32_0 : i32, i32
  }
  func.func @transform_16(%arg0: i32, %arg1: i32) -> (i32, i32, i32) {
    %c0_i32 = arith.constant 0 : i32
    %c0_i32_0 = arith.constant 0 : i32
    return %arg0, %arg1, %c0_i32 : i32, i32, i32
  }
}

</mosaic_0001>

<bundles_post_ra>
// kernel: tpu_custom_call.1
= control target key start
LH: loop header
LB: loop body
LE: loop exit
PB: predicated region body
PF: predicated region fallthrough
CT: control target
= control target key end

     0   :  { %s4308_s0 = inlined_call_operand.vmem [shape: bf16[2,32,32], index: 0, kind: input, shape index: {}]   ;;  %s4309_s1 = inlined_call_operand.vmem [shape: bf16[2,32,32], index: 1, kind: input, shape index: {}]   ;;  %s4310_s2 = inlined_call_operand.vmem [shape: bf16[2,16,32], index: 2, kind: input, shape index: {}]   ;;  %s4311_s3 = inlined_call_operand.vmem [shape: f32[2,32,1], index: 3, kind: input, shape index: {}]   ;;  %s4312_s4 = inlined_call_operand.hbm [shape: f32[2,1,48], index: 4, kind: input, shape index: {}]   ;;  %s4313_s5 = inlined_call_operand.vmem [shape: bf16[32,32], index: 5, kind: input, shape index: {}]   ;;  %s4314_s6 = inlined_call_operand.vmem [shape: bf16[32,32], index: 6, kind: input, shape index: {}]   ;;  %s4315_s7 = inlined_call_operand.vmem [shape: bf16[32,32], index: 7, kind: input, shape index: {}]   ;;  %s4316_s8 = inlined_call_operand.hbm [shape: bf16[32,32], index: 8, kind: input, shape index: {}]   ;;  %s4317_s9 = inlined_call_operand.hbm [shape: f32[1,32], index: 9, kind: input, shape index: {}]   ;;  %s4318_s10 = inlined_call_operand.vmem [shape: f32[32,4], index: 10, kind: input, shape index: {}]   ;;  %s4319_s11 = inlined_call_operand.vmem [shape: f32[4,32], index: 11, kind: input, shape index: {}]   ;;  %s4320_s12 = inlined_call_operand.vmem [shape: f32[1,32], index: 12, kind: input, shape index: {}]   ;;  %s4321_s13 = inlined_call_operand.vmem [shape: f32[1,32], index: 13, kind: input, shape index: {}]   ;;  %s4322_s14 = inlined_call_operand.vmem [shape: f32[1,32], index: 14, kind: input, shape index: {}]   ;;  %s4323_s15 = inlined_call_operand.vmem [shape: f32[1,32], index: 15, kind: input, shape index: {}]   ;;  %s4324_s16 = inlined_call_operand.hbm [shape: f32[2,32,32], index: 16, kind: output, shape index: {}]  }
   0x1   :  { %4347 = sst [smem:[#allocation25_spill]] %s4308_s0 }
   0x2   :  { %4348 = sst [smem:[#allocation26_spill]] %s4311_s3 }
   0x3   :  { %4349 = sst [smem:[#allocation27_spill]] %s4312_s4 }
   0x4   :  { %4350 = sst [smem:[#allocation28_spill]] %s4313_s5 }
   0x5   :  { %4351 = sst [smem:[#allocation29_spill]] %s4314_s6 }
   0x6   :  { %4352 = sst [smem:[#allocation30_spill]] %s4315_s7 }
   0x7   :  { %4353 = sst [smem:[#allocation31_spill]] %s4316_s8 }
   0x8   :  { %4354 = sst [smem:[#allocation32_spill]] %s4317_s9 }
   0x9   :  { %4355 = sst [smem:[#allocation33_spill]] %s4318_s10 }
   0xa   :  { %4356 = sst [smem:[#allocation34_spill]] %s4319_s11 }
   0xb   :  { %4357 = sst [smem:[#allocation35_spill]] %s4320_s12 }
   0xc   :  { %4358 = sst [smem:[#allocation36_spill]] %s4321_s13 }
   0xd   :  { %4359 = sst [smem:[#allocation37_spill]] %s4322_s14 }
   0xe   :  { %4360 = sst [smem:[#allocation38_spill]] %s4323_s15 }
   0xf   :  { %4361 = sst [smem:[#allocation39_spill]] %s4324_s16 }
  0x10   :  { %21 = vsyncpa [#allocation6], 0 }
  0x11   :  { %23 = vsyncpa [#allocation6 + $0x1], 0 }
  0x12   :  { %24 = vsyncpa [#allocation9], 0 }
  0x13   :  { %25 = vsyncpa [#allocation7], 0 }
  0x14   :  { %27 = vsyncpa [#allocation7 + $0x1], 0  ;;  %s3640_s21 = smov 0   ;;  %s3642_s22 = smov 0  }
  0x15   :  { %s3644_s23 = smov 0   ;;  %s3646_s24 = smov 0  }
  0x16   :  { %s3648_s25 = smov 0   ;;  %s3650_s26 = smov 0  }
  0x17   :  { %s3652_s27 = smov 0   ;;  %s3654_s28 = smov 0  }
  0x18   :  { %s3656_s29 = smov 0   ;;  %s3658_s30 = smov 0  }
  0x19   :  { %s3660_s0 = smov 0  }
  0x1a LB: > { %4362 = sst [smem:[#allocation15_spill]] %s3495_s21  ;;  %s2676_s17 = sadd.s32 4294967295, %s3535_s0   ;;  %s3535_s0 = sphi %s3660_s0, %s33_s0   ;;  %s3531_s30 = sphi %s3658_s30, %s4412_s30   ;;  %s3527_s29 = sphi %s3656_s29, %s4411_s29   ;;  %s3523_s28 = sphi %s3654_s28, %s4410_s28   ;;  %s3519_s27 = sphi %s3652_s27, %s4409_s27   ;;  %s3515_s26 = sphi %s3650_s26, %s4408_s26   ;;  %s3511_s25 = sphi %s3648_s25, %s4407_s25   ;;  %s3507_s24 = sphi %s3646_s24, %s4406_s24   ;;  %s3503_s23 = sphi %s3644_s23, %s4415_s23   ;;  %s3499_s22 = sphi %s3642_s22, %s4414_s22   ;;  %s3495_s21 = sphi %s3640_s21, %s4413_s21  }
  0x1b   : > { %4363 = sst [smem:[#allocation16_spill]] %s3511_s25  ;;  %s2677_s18 = sadd.s32 4294967294, %s3535_s0  }
  0x1c   : > { %4364 = sst [smem:[#allocation17_spill]] %s3515_s26  ;;  %p173_p0 = scmp.ne.s32.totalorder %s3511_s25, %s3507_s24 }
  0x1d   : > { %4365 = sst [smem:[#allocation18_spill]] %s3527_s29  ;;  %p3696_p1 = scmp.eq.s32.totalorder %s2676_s17, 0 }
  0x1e   : > { %4366 = sst [smem:[#allocation19_spill]] %s3531_s30  ;;  %p429_p2 = scmp.ne.s32.totalorder %s3503_s23, %s3499_s22 }
  0x1f   : > { %s4367_s19 = scalar_select %p3696_p1, 1, 0 }
  0x20   : > { %p430_p3 = scmp.eq.s32.totalorder %s2676_s17, 3  ;;  %p3704_p4 = por %p3696_p1, %p173_p0 }
  0x21   : > { %p435_p5 = scmp.ne.s32.totalorder %s3499_s22, %s3495_s21  ;;  %p436_p7 = scmp.eq.s32.totalorder %s2677_s18, 3 }
  0x22   : > { %s4368_s20 = scalar_select %p3704_p4, 1, 0 }
  0x23   : > { %p3710_p6 = por %p430_p3, %p429_p2  ;;  %p2678_p8 = scmp.ge.s32.totalorder %s3535_s0, 1 }
  0x24   : > { %p443_p9 = scmp.lt.s32.totalorder %s3535_s0, 5  ;;  %p3716_p10 = por %p436_p7, %p435_p5 }
  0x25   : > { %s4369_s16 = scalar_select %p3710_p6, 1, 0 }
  0x26   : > { %s4371_s24 = scalar_select %p3716_p10, 1, 0 }
  0x27   : > { %4370 = sst [smem:[#allocation20_spill]] %s4369_s16  ;;  %p3720_p11 = pnand %p2678_p8, %p443_p9 }
  0x28   : > { %4372 = sst [smem:[#allocation21_spill]] %s4371_s24  ;;  %s3537_s17 = smov [#allocation8]  }
  0x29   : > { %s4373_s13 = scalar_select %p3720_p11, 1, 0 }
  0x2a   : > { %s464_s12 = sshll.u32 %s3537_s17, 4  ;;  %p3136_p12 = pneg %p3720_p11  ;;  %s465_s12 = int_to_ptr.vmem [resolvable:$true] %s464_s12 }
  0x2b   : > { %s3538_s18 = smov [#allocation10]   ;;  %s4375_s8 = sld [smem:[#allocation31_spill]] }
  0x2c   : > { %p3728_p13 = pnand %p3136_p12, %p3696_p1  ;;  %s478_s16 = sshll.u32 %s3538_s18, 4  ;;  %s3732_s16 = int_to_ptr.vmem [resolvable:$true] %s478_s16 }
  0x2e   : > { %p3325_p2 = pneg %p3728_p13 }
  0x31   : > { %s3323_s15 = scalar_lea.hbm %s4375_s8, 256 }
  0x32   : > { %p3324_p0 = scmp.ne.s32.totalorder %s4375_s8, %s3323_s15  ;;  %p3330_p7 = scmp.lt.u32.totalorder %s3323_s15, %s4375_s8 }
  0x34   : > { %p3326_p3 = pnand %p3325_p2, %p3324_p0 }
  0x36   : > { %p3327_p5 = pneg %p3326_p3 }
  0x38   : > { %p3332_p8 = pnand %p3330_p7, %p3327_p5 }
  0x3a   : > { %3335 = shalt.err (!%p3332_p8)
}
  0x3b   : > { %s3336_s18 = scalar_lea.vmem %s465_s12, 256  ;;  %p3344_p6 = scmp.lt.s32.totalorder %s465_s12, %s465_s12 }
  0x3c   : > { %p3337_p9 = scmp.ne.s32.totalorder %s465_s12, %s3336_s18  ;;  %p3345_p1 = scmp.lt.s32.totalorder %s3336_s18, %s3336_s18 }
  0x3e   : > { %p3339_p12 = pnand %p3337_p9, %p3325_p2  ;;  %p3346_p4 = por %p3345_p1, %p3344_p6 }
  0x40   : > { %p3340_p10 = pneg %p3339_p12 }
  0x42   : > { %p3347_p11 = pnand %p3346_p4, %p3340_p10 }
  0x44   : > { %3350 = shalt.err (!%p3347_p11)
}
  0x45   : > { %s3539_s5 = smov 64   ;;  %s3540_s14 = smov 4  }
  0x46   : > { %3139 = dma.hbm_to_vmem [thread:$0]  (!%p3728_p13), %s4375_s8, 256, %s465_s12, [#allocation9], %s3539_s5, %s3539_s5, %s3540_s14  }
  0x47   : > { %s4376_s9 = sld [smem:[#allocation32_spill]] }
  0x4d   : > { %s3351_s17 = scalar_lea.hbm %s4376_s9, 16 }
  0x4e   : > { %p3352_p0 = scmp.ne.s32.totalorder %s4376_s9, %s3351_s17  ;;  %p3358_p6 = scmp.lt.u32.totalorder %s3351_s17, %s4376_s9 }
  0x50   : > { %p3354_p1 = pnand %p3352_p0, %p3325_p2 }
  0x52   : > { %p3355_p4 = pneg %p3354_p1 }
  0x54   : > { %p3360_p10 = pnand %p3358_p6, %p3355_p4 }
  0x56   : > { %3363 = shalt.err (!%p3360_p10)
}
  0x57   : > { %s3364_s12 = scalar_lea.vmem %s3732_s16, 16  ;;  %s3371_s6 = scalar_lea.vmem %s3732_s16, 32 }
  0x58   : > { %p3365_p11 = scmp.ne.s32.totalorder %s3732_s16, %s3364_s12  ;;  %p3372_p7 = scmp.lt.s32.totalorder %s3732_s16, %s3732_s16 }
  0x59   : > { %p3373_p8 = scmp.lt.s32.totalorder %s3371_s6, %s3364_s12 }
  0x5a   : > { %p3367_p3 = pnand %p3365_p11, %p3325_p2 }
  0x5b   : > { %p3374_p9 = por %p3373_p8, %p3372_p7 }
  0x5c   : > { %p3368_p5 = pneg %p3367_p3 }
  0x5e   : > { %p3375_p12 = pnand %p3374_p9, %p3368_p5 }
  0x60   : > { %3378 = shalt.err (!%p3375_p12)
}
  0x61   : > { %3142 = dma.hbm_to_vmem [thread:$0]  (!%p3728_p13), %s4376_s9, 16, %s3732_s16, [#allocation9]  }
  0x62   : > { %s42_s5 = sadd.s32 1, %s3527_s29  ;;  %s45_s21 = sadd.s32 1, %s3531_s30 }
  0x63   : > { %p43_p2 = scmp.ge.s32.totalorder %s42_s5, 2  ;;  %s160_s14 = sadd.s32 1, %s3515_s26 }
  0x64   : > { %p167_p0 = scmp.ne.s32.totalorder %s3515_s26, %s3511_s25  ;;  %p168_p1 = scmp.eq.s32.totalorder %s3535_s0, 0 }
  0x65   : > { %s4417_s5 = smov (%p43_p2, %s42_s5), 0  ;;  %s4419_s21 = smov (!%p43_p2, %s45_s21), %s3531_s30 }
  0x66   : > { %4377 = sst [smem:[#allocation22_spill]] %s4417_s5  ;;  %s415_s7 = ssub.s32 %s3527_s29, %s4417_s5 }
  0x67   : > { %p47_p4 = scmp.ge.s32.totalorder %s4419_s21, 2  ;;  %s419_s11 = sadd.s32 1, %s3503_s23 }
  0x68   : > { %p3794_p6 = por %p168_p1, %p167_p0  ;;  %p3153_p13 = scmp.lt.s32.totalorder %s3535_s0, 4 }
  0x69   : > { %s4421_s21 = smov (%p47_p4, %s4419_s21), 0  ;;  %s549_s15 = sand.u32 1, %s3515_s26  }
  0x6a   : > { %4379 = sst [smem:[#allocation23_spill]] %s4421_s21  ;;  %s2682_s24 = sshll.u32 %s3531_s30, 4 }
  0x6b   : > { %s157_s17 = ssub.s32 %s3531_s30, %s4421_s21  ;;  %s4381_s4 = sld [smem:[#allocation27_spill]] }
  0x6c   : > { %p158_p10 = scmp.eq.s32.totalorder %s157_s17, 0  ;;  %s416_s18 = sor.u32 %s415_s7, %s157_s17 }
  0x6d   : > { %p417_p11 = scmp.eq.s32.totalorder %s416_s18, 0  ;;  %s552_s9 = scalar_lea.vmem [#allocation5], %s549_s15 }
  0x6e   : > { %s3806_s12 = scalar_select %p158_p10, %s3515_s26, %s160_s14  }
  0x6f   : > { %s3809_s6 = scalar_select %p417_p11, %s3503_s23, %s419_s11  }
  0x70   : > { %4380 = sst [smem:[#allocation24_spill]] %s3806_s12  ;;  %s559_s5 = sshll.u32 %s552_s9, 4  ;;  %s3816_s5 = int_to_ptr.vmem [resolvable:$true] %s559_s5 }
  0x71   : > { %s3814_s8 = scalar_lea.hbm %s4381_s4, %s2682_s24  ;;  %p3822_p3 = pnand %p3153_p13, %p3794_p6 }
  0x72   : > { %s550_s7 = scalar_lea.sflag [#allocation6], %s549_s15  ;;  %s3379_s11 = scalar_lea.hbm %s3814_s8, 16 }
  0x73   : > { %p3380_p5 = scmp.ne.s32.totalorder %s3814_s8, %s3379_s11  ;;  %p3381_p7 = pneg %p3822_p3 }
  0x74   : > { %s3384_s16 = scalar_lea.hbm %s4381_s4, 32  ;;  %p3385_p12 = scmp.lt.u32.totalorder %s3814_s8, %s4381_s4 }
  0x75   : > { %p3382_p8 = pnand %p3381_p7, %p3380_p5  ;;  %p3386_p2 = scmp.lt.u32.totalorder %s3384_s16, %s3379_s11 }
  0x76   : > { %p3388_p1 = scmp.lt.u32.totalorder %s3379_s11, %s3814_s8 }
  0x77   : > { %p3383_p9 = pneg %p3382_p8  ;;  %p3387_p0 = por %p3386_p2, %p3385_p12 }
  0x79   : > { %p3389_p4 = por %p3388_p1, %p3387_p0 }
  0x7b   : > { %p3390_p6 = pnand %p3389_p4, %p3383_p9 }
  0x7d   : > { %3393 = shalt.err (!%p3390_p6)
}
  0x7e   : > { %s3394_s15 = scalar_lea.vmem %s3816_s5, 16  ;;  %s3541_s3 = smov [#allocation5]  }
  0x7f   : > { %p3395_p13 = scmp.ne.s32.totalorder %s3816_s5, %s3394_s15  ;;  %s3399_s10 = sshll.u32 %s3541_s3, 4  ;;  %s3400_s10 = int_to_ptr.vmem [resolvable:$false] %s3399_s10 }
  0x80   : > { %s3401_s9 = scalar_lea.vmem %s3400_s10, 32  ;;  %p3402_p5 = scmp.lt.s32.totalorder %s3816_s5, %s3400_s10 }
  0x81   : > { %p3397_p10 = pnand %p3395_p13, %p3381_p7  ;;  %p3403_p8 = scmp.lt.s32.totalorder %s3401_s9, %s3394_s15 }
  0x83   : > { %p3398_p11 = pneg %p3397_p10  ;;  %p3404_p12 = por %p3403_p8, %p3402_p5 }
  0x85   : > { %p3405_p2 = pnand %p3404_p12, %p3398_p11 }
  0x87   : > { %3408 = shalt.err (!%p3405_p2)
}
  0x88   : > { %3146 = dma.hbm_to_vmem [thread:$0]  (!%p3822_p3), %s3814_s8, 16, %s3816_s5, %s550_s7  }
  0x89   : > { %p4383_p9 = scmp.ne.s32.totalorder %s4373_s13, 0 }
  0x8a   : > { %s570_s11 = sand.u32 (!%p4383_p9), 1, %s3511_s25   ;;  %p4384_p7 = scmp.ne.s32.totalorder (!%p4383_p9), %s4368_s20, 0 }
  0x8b   : > { %568 = sbr.rel (%p4383_p9) target bundleno = 4542 (0x11be), region = 84  ;;  %s571_s24 = scalar_lea.sflag (!%p4383_p9), [#allocation6], %s570_s11 }
  0x8c   : > { %s3854_s16 = scalar_lea.vmem (!%p4383_p9), [#allocation5], %s570_s11 }
  0x92   : > { %3482 = dma.done.wait (%p4384_p7), %s571_s24, 16  }
  0x93   : > { %3484 = vsyncadd (%p4384_p7), %s571_s24, 4294967280  ;;  %p4385_p0 = scmp.ne.s32.totalorder %s4367_s19, 0 }
  0x95   : > { %3486 = dma.done.wait (%p4385_p0), [#allocation9], 272  }
  0x96   : > { %3488 = vsyncadd (%p4385_p0), [#allocation9], 4294967024  ;;  %s4342_s8 = sand.u32 1, %s3499_s22   ;;  %s3866_s13 = sshll.u32 %s3519_s27, 1 }
  0x97   : > { %s2686_s5 = sshll.u32 %s4342_s8, 4  ;;  %p658_p3 = scmp.lt.s32.totalorder %s3523_s28, 1 }
  0x98   : > { %p660_p1 = scmp.lt.s32.totalorder %s3866_s13, 3  ;;  %s4386_s4 = sld [smem:[#allocation25_spill]] }
  0x99   : > { %s659_s20 = scalar_select %p658_p3, %s3523_s28, 1 }
  0x9a   : > { %s661_s14 = scalar_select %p660_p1, %s3866_s13, 3 }
  0x9b   : > { %s2688_s7 = sshll.u32 %s659_s20, 2  ;;  %s2774_s17 = sshll.u32 %s659_s20, 4 }
  0x9c   : > { %s663_s19 = sadd.s32 %s2688_s7, %s661_s14  ;;  %s3877_s3 = scalar_lea.vmem %s4309_s1, %s2774_s17 }
  0x9d   : > { %s2689_s10 = sshll.u32 %s663_s19, 2  ;;  %s2775_s9 = sshll.u32 %s659_s20, 3 }
  0x9e   : > { %s3882_s21 = scalar_lea.vmem %s4386_s4, %s2689_s10  ;;  %s3887_s29 = scalar_lea.vmem %s4310_s2, %s2775_s9 }
  0x9f   : > { %s2696_s12 = sshll.u32 %s663_s19, 3  ;;  %s4387_s7 = sld [smem:[#allocation26_spill]] }
  0xa0   : > { %s3894_s17 = scalar_lea.vmem [#allocation11], %s2686_s5  ;;  %p2697_p4 = scmp.ne.s32.totalorder %s3519_s27, 0 }
  0xa1   : > { %s4388_s4 = sld [smem:[#allocation29_spill]] (!%p2697_p4)  ;;  %v3542_v1 = vmov (!%p2697_p4), 0.0   ;;  %vm3543_vm0 = vmmov (!%p2697_p4), 0   ;;  %v3263_v3 = vld [vmem:[%s3877_s3] sm:$0xff] (!%p2697_p4)   ;;  %vm730_vm1 = vcmask (!%p2697_p4), 261120   ;;  %v3264_v10 = vld [vmem:[%s3877_s3 + $0x8] sm:$0xff] (!%p2697_p4)  }
  0xa2   : > { %692 = sbr.rel (%p2697_p4) target bundleno = 1286 (0x506), region = 100  ;;  %2876 = vmatprep.subr.bf16.mxu0 (!%p2697_p4), %v3542_v1  ;;  %2892 = vmatprep.subr.bf16.mxu1 (!%p2697_p4), %v3542_v1  ;;  %v3265_v11 = vld [vmem:[%s3887_s29] sm:$0xff] (!%p2697_p4)   ;;  %s4391_s8 = sld [smem:[#allocation34_spill]] (!%p2697_p4)  ;;  %vm1009_vm2 = vcmask (!%p2697_p4), 1043456   ;;  %vm990_vm3 = vcmask (!%p2697_p4), 31744  }
  0xa3   : > { %2880 = vmatprep.mubr.msk.bf16.mxu0 (!%p2697_p4), %vm3543_vm0, %v3542_v1  ;;  %2896 = vmatprep.mubr.msk.bf16.mxu1 (!%p2697_p4), %vm3543_vm0, %v3542_v1  ;;  %s4392_s27 = sld [smem:[#allocation37_spill]] (!%p2697_p4)  ;;  %s4393_s19 = sld [smem:[#allocation38_spill]] (!%p2697_p4) }
  0xa5   : > { %s3892_s25 = scalar_lea.vmem %s4387_s7, %s2696_s12  ;;  %s4389_s12 = sld [smem:[#allocation33_spill]] (!%p2697_p4) }
  0xa6   : > { %s4390_s7 = sld [smem:[#allocation30_spill]] (!%p2697_p4) }
  0xa7   : > { %v3261_v0 = vld [vmem:[%s4388_s4] sm:$0xff] (!%p2697_p4)   ;;  %v3262_v2 = vld [vmem:[%s4388_s4 + $0x8] sm:$0xff] (!%p2697_p4)  }
  0xa8   : > { %2877 = vmatpush3.bf16.msra.mxu0 (!%p2697_p4), %v3261_v0  ;;  %v876_v14 = vld [vmem:[%s4391_s8] sm:$0xf] (!%p2697_p4) }
  0xa9   : > { %2878 = vmatprep.subr.bf16.mxu0 %v3542_v1 }
  0xab   : > { %v872_v4 = vld [vmem:[%s4389_s12] sm:$0xff]  ;;  %v873_v5 = vld [vmem:[%s4389_s12 + $0x8] sm:$0xff]  ;;  %v874_v6 = vld [vmem:[%s4389_s12 + $0x10] sm:$0xff] }
  0xac   : > { %2879 = vmatpush3.bf16.msra.mxu0 %v3262_v2  ;;  %v3092_v7 = vpack.c.bf16 %v873_v5, %v872_v4  ;;  %v875_v8 = vld [vmem:[%s4389_s12 + $0x18] sm:$0xff]  ;;  %v3266_v12 = vld [vmem:[%s4390_s7] sm:$0xff]   ;;  %v3267_v13 = vld [vmem:[%s4390_s7 + $0x8] sm:$0xff]  }
  0xad   : > { %v3096_v9 = vpack.c.bf16 %v875_v8, %v874_v6  ;;  %2893 = vmatpush3.bf16.msra.mxu1 %v3266_v12 }
  0xae   : > { %3093 = vmatprep.subr.bf16.mxu0 %v3092_v7  ;;  %2894 = vmatprep.subr.bf16.mxu1 %v3542_v1 }
  0xaf   : > { %2881 = vmatmul.mubr.msk.bf16.vlgmr.msra.gmra.mrb[0].mxu0 %vm730_vm1, %v3263_v3 }
  0xb0   : > { %2884 = vmatprep.mubr.msk.bf16.mxu0 %vm3543_vm0, %v3542_v1  ;;  %3095 = vmatpush3.bf16.msra.mxu0 %v3092_v7 }
  0xb1   : > { %3097 = vmatprep.subr.bf16.mxu0 %v3096_v9  ;;  %2895 = vmatpush3.bf16.msra.mxu1 %v3267_v13 }
  0xb2   : > { %2925 = vmatprep.subr.msk.mxu1 %vm1009_vm2, %v876_v14 }
  0xb4   : > { %3099 = vmatpush3.bf16.msra.mxu0 %v3096_v9  ;;  %2897 = vmatmul.mubr.msk.bf16.vlgmr.msra.gmra.mrb[0].mxu1 %vm730_vm1, %v3263_v3 }
  0xb5   : > { %3101 = vmatprep.subr.bf16.mxu0 %v3092_v7  ;;  %2900 = vmatprep.mubr.msk.bf16.mxu1 %vm3543_vm0, %v3542_v1 }
  0xb6   : > { %2926 = vmatpush3.msk.msra.mxu1 %vm1009_vm2, %v876_v14 }
  0xb7   : > { %2885 = vmatmul.mubr.msk.bf16.gmra.mrb[4].mxu0 %vm730_vm1, %v3264_v10  ;;  %2953 = vmatprep.subr.msk.mxu1 %vm1009_vm2, %v876_v14 }
  0xb8   : > { %2888 = vmatprep.mubr.msk.bf16.mxu0 %vm3543_vm0, %v3542_v1 }
  0xbc   : > { %2901 = vmatmul.mubr.msk.bf16.gmra.mrb[4].mxu1 %vm730_vm1, %v3264_v10 }
  0xbd   : > { %2904 = vmatprep.mubr.msk.bf16.mxu1 %vm3543_vm0, %v3542_v1 }
  0xbf   : > { %2889 = vmatmul.mubr.msk.bf16.gmra.mrb[8].mxu0 %vm730_vm1, %v3265_v11 }
  0xc4   : > { %2905 = vmatmul.mubr.msk.bf16.gmra.mrb[8].mxu1 %vm730_vm1, %v3265_v11 }
 0x182   : > { %v774_v15 = vpop.f32.mrb[0].mxu0 }
 0x183   : > { %v2882_v16 = vpop.f32.mrb[1].mxu0  ;;  %2916 = vmatprep.mubr.msk.f32.mxu0 %vm730_vm1, %v774_v15 }
 0x184   : > { %v777_v17 = vpop.f32.mrb[2].mxu0 }
 0x185   : > { %v2883_v18 = vpop.f32.mrb[3].mxu0  ;;  %2917 = vmatmul.mubr.msk.f32.vlgmr.msra.gmra.mrb[12].mxu0 %vm730_vm1, %v777_v17 }
 0x186   : > { %3103 = vmatpush3.bf16.msra.mxu0 %v3092_v7 }
 0x187   : > { %3105 = vmatprep.subr.bf16.mxu0 %v3096_v9  ;;  %v847_v27 = vpop.f32.mrb[0].mxu1 }
 0x188   : > { %v2898_v28 = vpop.f32.mrb[1].mxu1 }
 0x189   : > { %v850_v29 = vpop.f32.mrb[2].mxu1 }
 0x18a   : > { %v782_v19 = vpop.f32.mrb[4].mxu0  ;;  %3107 = vmatpush3.bf16.msra.mxu0 %v3096_v9  ;;  %v1388_v30 = vpack.c.bf16 %v850_v29, %v847_v27  ;;  %v2899_v31 = vpop.f32.mrb[3].mxu1 }
 0x18b   : > { %v2886_v20 = vpop.f32.mrb[5].mxu0  ;;  %2919 = vmatprep.mubr.msk.f32.mxu0 %vm730_vm1, %v782_v19 }
 0x18c   : > { %v785_v21 = vpop.f32.mrb[6].mxu0  ;;  %1391 = vst.msk [vmem:[#allocation3] sm:$0xff] %vm730_vm1, %v1388_v30  ;;  %v2738_v20 = vld [vmem:[%s4393_s19] ss:$0 sm:$0xff] }
 0x18d   : > { %v2887_v22 = vpop.f32.mrb[7].mxu0  ;;  %2920 = vmatmul.mubr.msk.f32.gmra.mrb[14].mxu0 %vm730_vm1, %v785_v21 }
 0x18f   : > { %v855_v32 = vpop.f32.mrb[4].mxu1 }
 0x190   : > { %v2902_v33 = vpop.f32.mrb[5].mxu1 }
 0x191   : > { %v858_v34 = vpop.f32.mrb[6].mxu1 }
 0x192   : > { %v790_v23 = vpop.f32.mrb[8].mxu0  ;;  %v1389_v35 = vpack.c.bf16 %v858_v34, %v855_v32  ;;  %v2903_v36 = vpop.f32.mrb[7].mxu1 }
 0x193   : > { %v2890_v24 = vpop.f32.mrb[9].mxu0  ;;  %2922 = vmatprep.mubr.msk.f32.mxu0 %vm730_vm1, %v790_v23 }
 0x194   : > { %v793_v25 = vpop.f32.mrb[10].mxu0  ;;  %1392 = vst.msk [vmem:[#allocation3 + $0x8] sm:$0xff] %vm730_vm1, %v1389_v35 }
 0x195   : > { %v2891_v26 = vpop.f32.mrb[11].mxu0  ;;  %2923 = vmatmul.mubr.msk.f32.gmra.mrb[16].mxu0 %vm730_vm1, %v793_v25 }
 0x197   : > { %v863_v37 = vpop.f32.mrb[8].mxu1 }
 0x198   : > { %v2906_v38 = vpop.f32.mrb[9].mxu1 }
 0x199   : > { %v866_v39 = vpop.f32.mrb[10].mxu1 }
 0x19a   : > { %v1390_v40 = vpack.c.bf16 %v866_v39, %v863_v37  ;;  %v2907_v41 = vpop.f32.mrb[11].mxu1 }
 0x19c   : > { %1393 = vst.msk [vmem:[#allocation3 + $0x10] sm:$0xff] %vm730_vm1, %v1390_v40 }
 0x258   : > { %v2918_v42 = vpop.f32.mrb[12].mxu0 }
 0x259   : > { %v961_v43 = vpop.f32.mrb[13].mxu0 }
 0x25a   : > { %2927 = vmatprep.mubr.msk.f32.mxu1 %vm990_vm3, %v961_v43 }
 0x25b   : > { %2928 = vmatmul.mubr.msk.f32.vlgmr.msra.gmra.mrb[12].mxu1 %vm990_vm3, %v2918_v42 }
 0x25c   : > { %2954 = vmatpush3.msk.msra.mxu1 %vm1009_vm2, %v876_v14 }
 0x260   : > { %v2921_v44 = vpop.f32.mrb[14].mxu0 }
 0x261   : > { %v971_v45 = vpop.f32.mrb[15].mxu0 }
 0x262   : > { %2930 = vmatprep.mubr.msk.f32.mxu1 %vm990_vm3, %v971_v45 }
 0x263   : > { %2931 = vmatmul.mubr.msk.f32.gmra.mrb[14].mxu1 %vm990_vm3, %v2921_v44 }
 0x268   : > { %v2924_v46 = vpop.f32.mrb[16].mxu0 }
 0x269   : > { %v981_v47 = vpop.f32.mrb[17].mxu0 }
 0x26a   : > { %2933 = vmatprep.mubr.msk.f32.mxu1 %vm990_vm3, %v981_v47 }
 0x26b   : > { %2934 = vmatmul.mubr.msk.f32.gmra.mrb[16].mxu1 %vm990_vm3, %v2924_v46 }
 0x32e   : > { %v2929_v48 = vpop.f32.mrb[12].mxu1 }
 0x32f   : > { %v1109_v49 = vsub.f32 %v777_v17, %v2929_v48  ;;  %v1079_v50 = vpop.f32.mrb[13].mxu1  ;;  %v2737_v17 = vld [vmem:[%s4392_s27] ss:$0 sm:$0xff] }
 0x330   : > { %v1108_v51 = vsub.f32 %v774_v15, %v1079_v50 }
 0x331   : > { %v1115_v53 = vmul.f32 %v1109_v49, %v1109_v49 }
 0x332   : > { %v1114_v52 = vmul.f32 %v1108_v51, %v1108_v51 }
 0x334   : > { %2944 = vmatprep.mubr.msk.f32.mxu0 %vm730_vm1, %v1114_v52 }
 0x335   : > { %2945 = vmatmul.mubr.msk.f32.vlgmr.msra.gmra.mrb[18].mxu0 %vm730_vm1, %v1115_v53 }
 0x336   : > { %v2932_v54 = vpop.f32.mrb[14].mxu1 }
 0x337   : > { %v1111_v55 = vsub.f32 %v785_v21, %v2932_v54  ;;  %v1089_v56 = vpop.f32.mrb[15].mxu1 }
 0x338   : > { %v1110_v57 = vsub.f32 %v782_v19, %v1089_v56 }
 0x339   : > { %v1117_v59 = vmul.f32 %v1111_v55, %v1111_v55 }
 0x33a   : > { %v1116_v58 = vmul.f32 %v1110_v57, %v1110_v57 }
 0x33c   : > { %2947 = vmatprep.mubr.msk.f32.mxu0 %vm730_vm1, %v1116_v58 }
 0x33d   : > { %2948 = vmatmul.mubr.msk.f32.gmra.mrb[20].mxu0 %vm730_vm1, %v1117_v59 }
 0x33e   : > { %v2935_v60 = vpop.f32.mrb[16].mxu1 }
 0x33f   : > { %v1113_v61 = vsub.f32 %v793_v25, %v2935_v60  ;;  %v1099_v62 = vpop.f32.mrb[17].mxu1 }
 0x340   : > { %v1112_v63 = vsub.f32 %v790_v23, %v1099_v62 }
 0x341   : > { %v1119_v1 = vmul.f32 %v1113_v61, %v1113_v61 }
 0x342   : > { %v1118_v0 = vmul.f32 %v1112_v63, %v1112_v63 }
 0x344   : > { %2950 = vmatprep.mubr.msk.f32.mxu0 %vm730_vm1, %v1118_v0 }
 0x345   : > { %2951 = vmatmul.mubr.msk.f32.gmra.mrb[22].mxu0 %vm730_vm1, %v1119_v1 }
 0x408   : > { %v2946_v2 = vpop.f32.mrb[18].mxu0 }
 0x409   : > { %v1204_v3 = vpop.f32.mrb[19].mxu0 }
 0x40a   : > { %2955 = vmatprep.mubr.msk.f32.mxu1 %vm990_vm3, %v1204_v3 }
 0x40b   : > { %2956 = vmatmul.mubr.msk.f32.vlgmr.msra.gmra.mrb[18].mxu1 %vm990_vm3, %v2946_v2 }
 0x410   : > { %v2949_v4 = vpop.f32.mrb[20].mxu0 }
 0x411   : > { %v1214_v5 = vpop.f32.mrb[21].mxu0 }
 0x412   : > { %2958 = vmatprep.mubr.msk.f32.mxu1 %vm990_vm3, %v1214_v5 }
 0x413   : > { %2959 = vmatmul.mubr.msk.f32.gmra.mrb[20].mxu1 %vm990_vm3, %v2949_v4 }
 0x418   : > { %v2952_v6 = vpop.f32.mrb[22].mxu0 }
 0x419   : > { %v1224_v7 = vpop.f32.mrb[23].mxu0 }
 0x41a   : > { %2961 = vmatprep.mubr.msk.f32.mxu1 %vm990_vm3, %v1224_v7 }
 0x41b   : > { %2962 = vmatmul.mubr.msk.f32.gmra.mrb[22].mxu1 %vm990_vm3, %v2952_v6 }
 0x4de   : > { %v2957_v8 = vpop.f32.mrb[18].mxu1 }
 0x4df   : > { %v1323_v9 = vadd.f32 1e-05, %v2957_v8  ;;  %v1317_v10 = vpop.f32.mrb[19].mxu1 }
 0x4e0   : > { %v1318_v11 = vadd.f32 1e-05, %v1317_v10 }
 0x4e1   : > { %3268 = vrsqrt.f32 %v1323_v9 }
 0x4e2   : > { %3270 = vrsqrt.f32 %v1318_v11 }
 0x4e6   : > { %v2960_v12 = vpop.f32.mrb[20].mxu1 }
 0x4e7   : > { %v1333_v13 = vadd.f32 1e-05, %v2960_v12  ;;  %v1327_v14 = vpop.f32.mrb[21].mxu1 }
 0x4e8   : > { %v1328_v15 = vadd.f32 1e-05, %v1327_v14 }
 0x4e9   : > { %3272 = vrsqrt.f32 %v1333_v13 }
 0x4ea   : > { %3274 = vrsqrt.f32 %v1328_v15 }
 0x4eb   : > { %v3269_v16 = vpop.eup %3268 }
 0x4ec   : > { %v3271_v18 = vpop.eup %3270  ;;  %v1353_v19 = vmul.f32 %v3269_v16, %v1109_v49 }
 0x4ed   : > { %v1352_v21 = vmul.f32 %v3271_v18, %v1108_v51 }
 0x4ee   : > { %v1365_v22 = vmul.f32 %v2737_v17, %v1353_v19  ;;  %v2963_v23 = vpop.f32.mrb[22].mxu1 }
 0x4ef   : > { %v1364_v24 = vmul.f32 %v2737_v17, %v1352_v21  ;;  %v1343_v25 = vadd.f32 1e-05, %v2963_v23  ;;  %v1337_v26 = vpop.f32.mrb[23].mxu1 }
 0x4f0   : > { %v1377_v27 = vadd.f32 %v2738_v20, %v1365_v22  ;;  %v1338_v28 = vadd.f32 1e-05, %v1337_v26 }
 0x4f1   : > { %v1376_v29 = vadd.f32 %v2738_v20, %v1364_v24  ;;  %3276 = vrsqrt.f32 %v1343_v25 }
 0x4f2   : > { %3278 = vrsqrt.f32 %v1338_v28 }
 0x4f3   : > { %v3273_v30 = vpop.eup %3272  ;;  %v1382_v31 = vpack.c.bf16 %v1377_v27, %v1376_v29 }
 0x4f4   : > { %v3275_v32 = vpop.eup %3274  ;;  %v1355_v33 = vmul.f32 %v3273_v30, %v1111_v55 }
 0x4f5   : > { %1385 = vst.msk [vmem:[#allocation2] sm:$0xff] %vm730_vm1, %v1382_v31  ;;  %v1354_v34 = vmul.f32 %v3275_v32, %v1110_v57 }
 0x4f6   : > { %v1367_v35 = vmul.f32 %v2737_v17, %v1355_v33 }
 0x4f7   : > { %v1366_v36 = vmul.f32 %v2737_v17, %v1354_v34 }
 0x4f8   : > { %v1379_v37 = vadd.f32 %v2738_v20, %v1367_v35 }
 0x4f9   : > { %v1378_v38 = vadd.f32 %v2738_v20, %v1366_v36 }
 0x4fb   : > { %v3277_v39 = vpop.eup %3276  ;;  %v1383_v40 = vpack.c.bf16 %v1379_v37, %v1378_v38 }
 0x4fc   : > { %v3279_v41 = vpop.eup %3278  ;;  %v1357_v42 = vmul.f32 %v3277_v39, %v1113_v61 }
 0x4fd   : > { %1386 = vst.msk [vmem:[#allocation2 + $0x8] sm:$0xff] %vm730_vm1, %v1383_v40  ;;  %v1356_v43 = vmul.f32 %v3279_v41, %v1112_v63 }
 0x4fe   : > { %v1369_v44 = vmul.f32 %v2737_v17, %v1357_v42 }
 0x4ff   : > { %v1368_v45 = vmul.f32 %v2737_v17, %v1356_v43 }
 0x500   : > { %v1381_v46 = vadd.f32 %v2738_v20, %v1369_v44 }
 0x501   : > { %v1380_v47 = vadd.f32 %v2738_v20, %v1368_v45 }
 0x503   : > { %v1384_v48 = vpack.c.bf16 %v1381_v46, %v1380_v47 }
 0x505   : > { %1387 = vst.msk [vmem:[#allocation2 + $0x10] sm:$0xff] %vm730_vm1, %v1384_v48 }
 0x506 PF: > { %s4394_s9 = sld [smem:[#allocation28_spill]]  ;;  %v3544_v50 = vmov 0.0   ;;  %vm3545_vm4 = vmmov 0   ;;  %v3989_v52 = vld [vmem:[%s3882_s21] sm:$0xff]   ;;  %s4395_s18 = sld [smem:[#allocation33_spill]]  ;;  %vm1417_vm5 = vcmask 261120  }
 0x507   : > { %2964 = vmatprep.subr.bf16.mxu0 %v3544_v50  ;;  %2968 = vmatprep.mubr.msk.bf16.mxu0 %vm3545_vm4, %v3544_v50  ;;  %s4396_s5 = sld [smem:[#allocation34_spill]]  ;;  %vm1557_vm6 = vcmask 1043456   ;;  %vm1550_vm7 = vcmask 31744   ;;  %v1829_v8 = vld [vmem:[%s3892_s25] sm:$0xff]  ;;  %v3546_v9 = vmov 0   ;;  %v1830_v10 = vld [vmem:[%s3892_s25 + $0x8] sm:$0xff] }
 0x508   : > { %3280 = vset.pattern.permute.xlu0 %v3546_v9  ;;  %v4025_v13 = vld [vmem:[#allocation2] sm:$0xff]  ;;  %vm1852_vm8 = vcmask 64512   ;;  %v4030_v15 = vld [vmem:[#allocation2 + $0x8] sm:$0xff]  ;;  %s3547_s25 = smov 120   ;;  %s4397_s10 = sld [smem:[#allocation35_spill]]  ;;  %vm1908_vm10 = vcmask 392192  }
 0x509   : > { %1834 = vperm.xlu0 %3280, %v1829_v8   ;;  %v1857_v14 = vsel %vm1852_vm8, %v4025_v13, 0  ;;  %v1860_v16 = vsel %vm1852_vm8, %v4030_v15, 0  ;;  %s4398_s14 = sld [smem:[#allocation36_spill]]  ;;  %v2755_v34 = vld [vmem:[%s3854_s16] ss:$0 sm:$0xff]  ;;  %v4071_v47 = vld [vmem:[#allocation3] sm:$0xff] }
 0x50a   : > { %v4079_v48 = vld [vmem:[#allocation3 + $0x8] sm:$0xff]  ;;  %s3548_s16 = smov 112   ;;  %s3549_s20 = smov 104   ;;  %vm2129_vm12 = vcmask 130112   ;;  %vm2275_vm13 = vcmask 195712   ;;  %vm2421_vm14 = vcmask 261312  }
 0x50b   : > { %s3551_s3 = smov 16   ;;  %s3552_s30 = smov 24  }
 0x50c   : > { %v3281_v49 = vld [vmem:[%s4394_s9] sm:$0xff]   ;;  %v3282_v51 = vld [vmem:[%s4394_s9 + $0x8] sm:$0xff]   ;;  %v1466_v56 = vld [vmem:[%s4395_s18 + $0x10] sm:$0xff]  ;;  %s2770_s8 = sshll.u32 %s3523_s28, 2  ;;  %s4399_s26 = sld [smem:[#allocation20_spill]] }
 0x50d   : > { %2965 = vmatpush3.bf16.msra.mxu0 %v3281_v49  ;;  %v1464_v53 = vld [vmem:[%s4395_s18] sm:$0xff]  ;;  %v1465_v54 = vld [vmem:[%s4395_s18 + $0x8] sm:$0xff]  ;;  %v1467_v57 = vld [vmem:[%s4395_s18 + $0x18] sm:$0xff]  ;;  %1839 = vperm.xlu0 %3280, %v1830_v10   ;;  %s3550_s18 = smov 8   ;;  %s2510_s29 = sadd.s32 %s2770_s8, %s3866_s13 }
 0x50e   : > { %2966 = vmatprep.subr.bf16.mxu0 %v3544_v50  ;;  %v3108_v55 = vpack.c.bf16 %v1465_v54, %v1464_v53  ;;  %v3112_v58 = vpack.c.bf16 %v1467_v57, %v1466_v56  ;;  %v1468_v59 = vld [vmem:[%s4396_s5] sm:$0xf]  ;;  %v4035_v17 = vld [vmem:[#allocation2 + $0x10] sm:$0xff]  ;;  %v4083_v49 = vld [vmem:[#allocation3 + $0x10] sm:$0xff]  ;;  %s2771_s27 = sshll.u32 %s2510_s29, 7  ;;  %s2513_s21 = sshll.u32 %s3894_s17, 4  ;;  %s4240_s21 = int_to_ptr.vmem [resolvable:$true] %s2513_s21 }
 0x50f   : > { %v1863_v18 = vsel %vm1852_vm8, %v4035_v17, 0  ;;  %v2753_v24 = vld [vmem:[%s4397_s10] ss:$0 sm:$0xff]  ;;  %s4400_s5 = sld [smem:[#allocation39_spill]]  ;;  %s3409_s15 = scalar_lea.vmem %s4240_s21, 256 }
 0x510   : > { %3109 = vmatprep.subr.bf16.mxu1 %v3108_v55  ;;  %v2754_v28 = vld [vmem:[%s4398_s14] ss:$0 sm:$0xff]  ;;  %p3410_p6 = scmp.ne.s32.totalorder %s4240_s21, %s3409_s15  ;;  %s3553_s10 = smov [#allocation11]  }
 0x511   : > { %2967 = vmatpush3.bf16.msra.mxu0 %v3282_v51  ;;  %3111 = vmatpush3.bf16.msra.mxu1 %v3108_v55  ;;  %s3413_s11 = sshll.u32 %s3553_s10, 4  ;;  %s3414_s11 = int_to_ptr.vmem [resolvable:$false] %s3413_s11 }
 0x512   : > { %3113 = vmatprep.subr.bf16.mxu1 %v3112_v58  ;;  %3117 = vmatprep.subr.bf16.mxu0 %v3108_v55  ;;  %p4402_p13 = scmp.ne.s32.totalorder %s4399_s26, 0  ;;  %s3415_s24 = scalar_lea.vmem %s3414_s11, 512 }
 0x513   : > { %1984 = vrot.lane.b32.xlu0 %v4025_v13, %s3547_s25  ;;  %p3416_p5 = scmp.lt.s32.totalorder %s4240_s21, %s3414_s11  ;;  %p3417_p8 = scmp.lt.s32.totalorder %s3415_s24, %s3409_s15 }
 0x514   : > { %2969 = vmatmul.mubr.msk.bf16.vlgmr.msra.gmra.mrb[0].mxu0 %vm1417_vm5, %v3989_v52  ;;  %p3411_p10 = pnand %p3410_p6, %p4402_p13 }
 0x515   : > { %3115 = vmatpush3.bf16.msra.mxu1 %v3112_v58  ;;  %3119 = vmatpush3.bf16.msra.mxu0 %v3108_v55  ;;  %s4236_s13 = scalar_lea.hbm %s4400_s5, %s2771_s27  ;;  %p3418_p12 = por %p3417_p8, %p3416_p5 }
 0x516   : > { %3121 = vmatprep.subr.bf16.mxu0 %v3112_v58  ;;  %2983 = vmatprep.subr.msk.mxu1 %vm1557_vm6, %v1468_v59  ;;  %p3412_p11 = pneg %p3411_p10 }
 0x517   : > { %1988 = vrot.lane.b32.xlu0 %v4035_v17, %s3547_s25 }
 0x518   : > { %p3419_p2 = pnand %p3418_p12, %p3412_p11 }
 0x519   : > { %3123 = vmatpush3.bf16.msra.mxu0 %v3112_v58 }
 0x51a   : > { %3004 = vmatprep.subr.bf16.mxu0 %v3544_v50 }
 0x588   : > { %v1835_v35 = vpop.permute.xlu0 %1834 }
 0x589   : > { %v4059_v36 = vmul.f32 %v2755_v34, %v1835_v35 }
 0x58b   : > { %vm1850_vm9 = vcmp.gt.f32.partialorder %v4059_v36, 0.0 }
 0x58c   : > { %v1840_v37 = vpop.permute.xlu0 %1839 }
 0x58d   : > { %v4062_v38 = vmul.f32 %v2755_v34, %v1840_v37 }
 0x58f   : > { %vm1851_vm11 = vcmp.gt.f32.partialorder %v4062_v38, 0.0 }
 0x5e7   : > { %v1455_v60 = vpop.f32.mrb[0].mxu0 }
 0x5e8   : > { %v2970_v61 = vpop.f32.mrb[1].mxu0  ;;  %2980 = vmatprep.mubr.msk.f32.mxu1 %vm1417_vm5, %v1455_v60 }
 0x5e9   : > { %v1458_v62 = vpop.f32.mrb[2].mxu0 }
 0x5ea   : > { %v2971_v63 = vpop.f32.mrb[3].mxu0  ;;  %2981 = vmatmul.mubr.msk.f32.vlgmr.msra.gmra.mrb[0].mxu1 %vm1417_vm5, %v1458_v62 }
 0x5eb   : > { %2984 = vmatpush3.msk.msra.mxu1 %vm1557_vm6, %v1468_v59 }
 0x5ec   : > { %2999 = vmatprep.subr.msk.mxu1 %vm1557_vm6, %v1468_v59 }
 0x6bd   : > { %v2982_v0 = vpop.f32.mrb[0].mxu1 }
 0x6be   : > { %v1541_v1 = vpop.f32.mrb[1].mxu1 }
 0x6bf   : > { %2985 = vmatprep.mubr.msk.f32.mxu1 %vm1550_vm7, %v1541_v1 }
 0x6c0   : > { %2986 = vmatmul.mubr.msk.f32.vlgmr.msra.gmra.mrb[2].mxu1 %vm1550_vm7, %v2982_v0 }
 0x6c1   : > { %3000 = vmatpush3.msk.msra.mxu1 %vm1557_vm6, %v1468_v59 }
 0x6c2   : > { %3014 = vmatprep.subr.bf16.mxu1 %v3544_v50 }
 0x793   : > { %v2987_v2 = vpop.f32.mrb[2].mxu1 }
 0x794   : > { %v1637_v3 = vsub.f32 %v1458_v62, %v2987_v2  ;;  %v1627_v4 = vpop.f32.mrb[3].mxu1 }
 0x795   : > { %v1636_v5 = vsub.f32 %v1455_v60, %v1627_v4  ;;  %v1985_v60 = vpop.permute.xlu0 %1984 }
 0x796   : > { %v1639_v7 = vmul.f32 %v1637_v3, %v1637_v3  ;;  %v1994_v61 = vsel %vm1852_vm8, %v1985_v60, 0 }
 0x797   : > { %v1638_v6 = vmul.f32 %v1636_v5, %v1636_v5 }
 0x799   : > { %2996 = vmatprep.mubr.msk.f32.mxu0 %vm1417_vm5, %v1638_v6  ;;  %v1989_v1 = vpop.permute.xlu0 %1988 }
 0x79a   : > { %2997 = vmatmul.mubr.msk.f32.vlgmr.msra.gmra.mrb[4].mxu0 %vm1417_vm5, %v1639_v7  ;;  %v2000_v2 = vsel %vm1852_vm8, %v1989_v1, 0 }
 0x79b   : > { %3010 = vmatprep.mubr.msk.bf16.mxu0 %vm3545_vm4, %v3544_v50  ;;  %3005 = vmatpush3.bf16.xpose.msra.mxu0 %v1857_v14 }
 0x79c   : > { %3006 = vmatprep.subr.bf16.mxu0 %v3544_v50 }
 0x7a3   : > { %3007 = vmatpush3.bf16.xpose.msra.mxu0 %v1860_v16 }
 0x7a4   : > { %3008 = vmatprep.subr.bf16.mxu0 %v3544_v50 }
 0x7ab   : > { %3009 = vmatpush3.bf16.xpose.msra.mxu0 %v1863_v18 }
 0x7ac   : > { %3034 = vmatprep.subr.bf16.mxu0 %v3544_v50 }
 0x86d   : > { %v2998_v11 = vpop.f32.mrb[4].mxu0 }
 0x86e   : > { %v1712_v12 = vpop.f32.mrb[5].mxu0 }
 0x86f   : > { %3001 = vmatprep.mubr.msk.f32.mxu1 %vm1550_vm7, %v1712_v12 }
 0x870   : > { %3002 = vmatmul.mubr.msk.f32.vlgmr.msra.gmra.mrb[4].mxu1 %vm1550_vm7, %v2998_v11 }
 0x871   : > { %3020 = vmatprep.mubr.msk.bf16.mxu1 %vm3545_vm4, %v3544_v50  ;;  %3015 = vmatpush3.bf16.msra.mxu1 %v4071_v47 }
 0x872   : > { %3016 = vmatprep.subr.bf16.mxu1 %v3544_v50 }
 0x875   : > { %3017 = vmatpush3.bf16.msra.mxu1 %v4079_v48 }
 0x876   : > { %3018 = vmatprep.subr.bf16.mxu1 %v3544_v50 }
 0x879   : > { %3019 = vmatpush3.bf16.msra.mxu1 %v4083_v49 }
 0x87a   : > { %3024 = vmatprep.subr.bf16.mxu1 %v3544_v50 }
 0x943   : > { %v3003_v19 = vpop.f32.mrb[4].mxu1 }
 0x944   : > { %v1799_v20 = vadd.f32 1e-05, %v3003_v19  ;;  %v1793_v21 = vpop.f32.mrb[5].mxu1 }
 0x945   : > { %v1794_v22 = vadd.f32 1e-05, %v1793_v21 }
 0x946   : > { %3287 = vrsqrt.f32 %v1799_v20 }
 0x947   : > { %3289 = vrsqrt.f32 %v1794_v22 }
 0x950   : > { %v3288_v23 = vpop.eup %3287 }
 0x951   : > { %v3290_v25 = vpop.eup %3289  ;;  %v1805_v26 = vmul.f32 %v3288_v23, %v1637_v3 }
 0x952   : > { %v1804_v27 = vmul.f32 %v3290_v25, %v1636_v5 }
 0x953   : > { %v1813_v29 = vmul.f32 %v2753_v24, %v1805_v26 }
 0x954   : > { %v1812_v30 = vmul.f32 %v2753_v24, %v1804_v27 }
 0x955   : > { %v1821_v31 = vadd.f32 %v2754_v28, %v1813_v29 }
 0x956   : > { %v1820_v32 = vadd.f32 %v2754_v28, %v1812_v30 }
 0x958   : > { %v4050_v33 = vpack.c.bf16 %v1821_v31, %v1820_v32 }
 0x95a   : > { %1979 = vrot.lane.b32.xlu0 %v4050_v33, %s3547_s25  ;;  %3011 = vmatmul.mubr.msk.bf16.vlgmr.msra.gmra.mrb[8].mxu0 %vm1852_vm8, %v4050_v33 }
 0x95b   : > { %3040 = vmatprep.mubr.msk.bf16.mxu0 %vm3545_vm4, %v3544_v50 }
 0x95e   : > { %2067 = vrot.lane.b32.xlu0 %v4071_v47, %s3547_s25 }
 0x9cc   : > { %v1980_v3 = vpop.permute.xlu0 %1979 }
 0x9d0   : > { %v2068_v4 = vpop.permute.xlu0 %2067 }
 0x9d1   : > { %3035 = vmatpush3.bf16.msra.mxu0 %v2068_v4 }
 0x9d2   : > { %3036 = vmatprep.subr.bf16.mxu0 %v3544_v50 }
 0xa2d   : > { %v1899_v39 = vpop.f32.mrb[8].mxu0 }
 0xa2e   : > { %v1906_v40 = vsel %vm1850_vm9, %v1899_v39, -1e+30  ;;  %v3012_v41 = vpop.f32.mrb[9].mxu0 }
 0xa2f   : > { %v1902_v42 = vpop.f32.mrb[10].mxu0  ;;  %v1909_v43 = vsel %vm1908_vm10, %v1906_v40, -inf }
 0xa30   : > { %v1907_v44 = vsel %vm1851_vm11, %v1902_v42, -1e+30  ;;  %1910 = vmax.xlane.f32.xlu1 %v1909_v43  ;;  %v3013_v45 = vpop.f32.mrb[11].mxu0 }
 0xa31   : > { %v1912_v46 = vsel %vm1908_vm10, %v1907_v44, -inf }
 0xa34   : > { %1913 = vmax.xlane.f32.xlu1 %v1912_v46 }
 0xa45   : > { %1986 = vrot.lane.b32.xlu1 %v4030_v15, %s3547_s25 }
 0xabd   : > { %v1911_v51 = vpop.xlane.xlu1 %1910 }
 0xabe   : > { %v1915_v53 = vsub.f32 %v1906_v40, %v1911_v51 }
 0xac0   : > { %v1917_v54 = vmul.f32 1.442695, %v1915_v53 }
 0xac1   : > { %v1914_v55 = vpop.xlane.xlu1 %1913 }
 0xac2   : > { %v1916_v56 = vsub.f32 %v1907_v44, %v1914_v55  ;;  %3291 = vpow2.f32 %v1917_v54 }
 0xac4   : > { %v1919_v57 = vmul.f32 1.442695, %v1916_v56 }
 0xac5   : > { %v1987_v63 = vpop.permute.xlu1 %1986 }
 0xac6   : > { %3293 = vpow2.f32 %v1919_v57  ;;  %v1997_v0 = vsel %vm1852_vm8, %v1987_v63, 0 }
 0xacc   : > { %v4087_v58 = vpop.eup %3291 }
 0xad0   : > { %v4089_v59 = vpop.eup %3293 }
 0xad1   : > { %v1927_v62 = vpack.c.bf16 %v4089_v59, %v4087_v58 }
 0xad3   : > { %3021 = vmatmul.mubr.msk.bf16.vlgmr.msra.gmra.mrb[8].mxu1 %vm1908_vm10, %v1927_v62 }
 0xad4   : > { %3025 = vmatpush3.bf16.xpose.msra.mxu1 %v1994_v61  ;;  %3030 = vmatprep.mubr.msk.bf16.mxu1 %vm3545_vm4, %v3544_v50 }
 0xad5   : > { %3026 = vmatprep.subr.bf16.mxu1 %v3544_v50 }
 0xadc   : > { %3027 = vmatpush3.bf16.xpose.msra.mxu1 %v1997_v0 }
 0xadd   : > { %3028 = vmatprep.subr.bf16.mxu1 %v3544_v50 }
 0xae4   : > { %3029 = vmatpush3.bf16.xpose.msra.mxu1 %v2000_v2 }
 0xae5   : > { %3054 = vmatprep.subr.bf16.mxu1 %v3544_v50 }
 0xaeb   : > { %3031 = vmatmul.mubr.msk.bf16.vlgmr.msra.gmra.mrb[12].mxu1 %vm1852_vm8, %v1980_v3 }
 0xaec   : > { %3060 = vmatprep.mubr.msk.bf16.mxu1 %vm3545_vm4, %v3544_v50 }
 0xba6   : > { %v4106_v5 = vpop.f32.mrb[8].mxu1 }
 0xba7   : > { %v3022_v6 = vpop.f32.mrb[9].mxu1 }
 0xba8   : > { %v4108_v7 = vpop.f32.mrb[10].mxu1 }
 0xba9   : > { %v3023_v8 = vpop.f32.mrb[11].mxu1 }
 0xbbe   : > { %v2036_v9 = vpop.f32.mrb[12].mxu1 }
 0xbbf   : > { %v2043_v10 = vsel %vm1850_vm9, %v2036_v9, -1e+30  ;;  %v3032_v11 = vpop.f32.mrb[13].mxu1 }
 0xbc0   : > { %v2039_v12 = vpop.f32.mrb[14].mxu1  ;;  %v2045_v14 = vsel %vm1908_vm10, %v2043_v10, -inf }
 0xbc1   : > { %v2044_v16 = vsel %vm1851_vm11, %v2039_v12, -1e+30  ;;  %2046 = vmax.xlane.f32.xlu0 %v2045_v14  ;;  %v3033_v18 = vpop.f32.mrb[15].mxu1 }
 0xbc2   : > { %v2048_v19 = vsel %vm1908_vm10, %v2044_v16, -inf }
 0xbc3   : > { %2049 = vmax.xlane.f32.xlu1 %v2048_v19 }
 0xbd4   : > { %2069 = vrot.lane.b32.xlu1 %v4079_v48, %s3547_s25 }
 0xbd7   : > { %2071 = vrot.lane.b32.xlu0 %v4083_v49, %s3547_s25  ;;  %s4401_s25 = sand.u32 1, %s3499_s22  }
 0xbd8   : > { %2135 = vrot.lane.b32.xlu1 %v4030_v15, %s3548_s16  ;;  %s4246_s19 = scalar_lea.sflag [#allocation7], %s4401_s25 }
 0xbdb   : > { %2133 = vrot.lane.b32.xlu0 %v4025_v13, %s3548_s16 }
 0xbdc   : > { %2131 = vrot.lane.b32.xlu1 %v4050_v33, %s3548_s16 }
 0xbdf   : > { %2137 = vrot.lane.b32.xlu0 %v4035_v17, %s3548_s16 }
 0xbe0   : > { %2215 = vrot.lane.b32.xlu1 %v4079_v48, %s3548_s16 }
 0xbe3   : > { %2213 = vrot.lane.b32.xlu0 %v4071_v47, %s3548_s16 }
 0xc4e   : > { %v2047_v20 = vpop.xlane.xlu0 %2046 }
 0xc4f   : > { %v2051_v21 = vsub.f32 %v2043_v10, %v2047_v20 }
 0xc50   : > { %v2050_v22 = vpop.xlane.xlu1 %2049 }
 0xc51   : > { %v2053_v23 = vmul.f32 1.442695, %v2051_v21  ;;  %v2052_v24 = vsub.f32 %v2044_v16, %v2050_v22 }
 0xc52   : > { %v2072_v27 = vpop.permute.xlu0 %2071 }
 0xc53   : > { %v2055_v25 = vmul.f32 1.442695, %v2052_v24  ;;  %3295 = vpow2.f32 %v2053_v23 }
 0xc54   : > { %v2070_v26 = vpop.permute.xlu1 %2069 }
 0xc55   : > { %3297 = vpow2.f32 %v2055_v25  ;;  %3037 = vmatpush3.bf16.msra.mxu0 %v2070_v26 }
 0xc56   : > { %3038 = vmatprep.subr.bf16.mxu0 %v3544_v50  ;;  %v2134_v28 = vpop.permute.xlu0 %2133 }
 0xc57   : > { %v2143_v31 = vsel %vm1852_vm8, %v2134_v28, 0 }
 0xc58   : > { %v2136_v34 = vpop.permute.xlu1 %2135 }
 0xc59   : > { %3039 = vmatpush3.bf16.msra.mxu0 %v2072_v27  ;;  %v2146_v35 = vsel %vm1852_vm8, %v2136_v34, 0 }
 0xc5a   : > { %3044 = vmatprep.subr.bf16.mxu0 %v3544_v50  ;;  %v2138_v37 = vpop.permute.xlu0 %2137 }
 0xc5b   : > { %v2149_v39 = vsel %vm1852_vm8, %v2138_v37, 0 }
 0xc5c   : > { %v2132_v40 = vpop.permute.xlu1 %2131 }
 0xc5d   : > { %v4134_v29 = vpop.eup %3295 }
 0xc5e   : > { %v2214_v41 = vpop.permute.xlu0 %2213  ;;  %v2057_v36 = vsel %vm1908_vm10, %v4134_v29, 0.0 }
 0xc5f   : > { %v4136_v30 = vpop.eup %3297  ;;  %3055 = vmatpush3.bf16.msra.mxu1 %v2214_v41 }
 0xc60   : > { %v2063_v32 = vpack.c.bf16 %v4136_v30, %v4134_v29  ;;  %3056 = vmatprep.subr.bf16.mxu1 %v3544_v50  ;;  %v2216_v42 = vpop.permute.xlu1 %2215  ;;  %v2060_v38 = vsel %vm1908_vm10, %v4136_v30, 0.0 }
 0xc62   : > { %3041 = vmatmul.mubr.msk.bf16.vlgmr.msra.gmra.mrb[12].mxu0 %vm1908_vm10, %v2063_v32 }
 0xc63   : > { %3045 = vmatpush3.bf16.xpose.msra.mxu0 %v2143_v31  ;;  %3050 = vmatprep.mubr.msk.bf16.mxu0 %vm3545_vm4, %v3544_v50 }
 0xc64   : > { %3046 = vmatprep.subr.bf16.mxu0 %v3544_v50  ;;  %3057 = vmatpush3.bf16.msra.mxu1 %v2216_v42 }
 0xc65   : > { %3058 = vmatprep.subr.bf16.mxu1 %v3544_v50 }
 0xc6b   : > { %3047 = vmatpush3.bf16.xpose.msra.mxu0 %v2146_v35 }
 0xc6c   : > { %3048 = vmatprep.subr.bf16.mxu0 %v3544_v50 }
 0xc73   : > { %3049 = vmatpush3.bf16.xpose.msra.mxu0 %v2149_v39 }
 0xc74   : > { %3074 = vmatprep.subr.bf16.mxu0 %v3544_v50 }
 0xc7a   : > { %3051 = vmatmul.mubr.msk.bf16.vlgmr.msra.gmra.mrb[16].mxu0 %vm1852_vm8, %v2132_v40 }
 0xc7b   : > { %3080 = vmatprep.mubr.msk.bf16.mxu0 %vm3545_vm4, %v3544_v50 }
 0xd35   : > { %v4154_v43 = vpop.f32.mrb[12].mxu0 }
 0xd36   : > { %v3042_v44 = vpop.f32.mrb[13].mxu0 }
 0xd37   : > { %v4156_v45 = vpop.f32.mrb[14].mxu0 }
 0xd38   : > { %v3043_v46 = vpop.f32.mrb[15].mxu0 }
 0xd39   : > { %v1921_v46 = vsel %vm1908_vm10, %v4087_v58, 0.0 }
 0xd4d   : > { %v2185_v51 = vpop.f32.mrb[16].mxu0 }
 0xd4e   : > { %v2192_v53 = vsel %vm1850_vm9, %v2185_v51, -1e+30  ;;  %v3052_v54 = vpop.f32.mrb[17].mxu0  ;;  %v1924_v51 = vsel %vm1908_vm10, %v4089_v59, 0.0 }
 0xd4f   : > { %v2188_v55 = vpop.f32.mrb[18].mxu0  ;;  %v2194_v56 = vsel %vm1908_vm10, %v2192_v53, -inf }
 0xd50   : > { %v2193_v57 = vsel %vm1851_vm11, %v2188_v55, -1e+30  ;;  %2195 = vmax.xlane.f32.xlu0 %v2194_v56  ;;  %v3053_v60 = vpop.f32.mrb[19].mxu0 }
 0xd51   : > { %v2197_v61 = vsel %vm1908_vm10, %v2193_v57, -inf }
 0xd52   : > { %2198 = vmax.xlane.f32.xlu1 %v2197_v61 }
 0xd63   : > { %2279 = vrot.lane.b32.xlu1 %v4025_v13, %s3549_s20 }
 0xd66   : > { %2217 = vrot.lane.b32.xlu0 %v4083_v49, %s3548_s16 }
 0xd67   : > { %2283 = vrot.lane.b32.xlu1 %v4035_v17, %s3549_s20 }
 0xd6a   : > { %2281 = vrot.lane.b32.xlu0 %v4030_v15, %s3549_s20 }
 0xd6e   : > { %2277 = vrot.lane.b32.xlu0 %v4050_v33, %s3549_s20 }
 0xddd   : > { %v2196_v62 = vpop.xlane.xlu0 %2195 }
 0xdde   : > { %v2200_v63 = vsub.f32 %v2192_v53, %v2196_v62 }
 0xddf   : > { %v2199_v0 = vpop.xlane.xlu1 %2198 }
 0xde0   : > { %v2202_v1 = vmul.f32 1.442695, %v2200_v63  ;;  %v2201_v2 = vsub.f32 %v2193_v57, %v2199_v0 }
 0xde1   : > { %v2218_v3 = vpop.permute.xlu0 %2217 }
 0xde2   : > { %v2204_v4 = vmul.f32 1.442695, %v2201_v2  ;;  %3059 = vmatpush3.bf16.msra.mxu1 %v2218_v3  ;;  %3299 = vpow2.f32 %v2202_v1 }
 0xde3   : > { %3064 = vmatprep.subr.bf16.mxu1 %v3544_v50  ;;  %v2280_v13 = vpop.permute.xlu1 %2279 }
 0xde4   : > { %3301 = vpow2.f32 %v2204_v4  ;;  %v2289_v15 = vsel %vm1852_vm8, %v2280_v13, 0 }
 0xde5   : > { %v2282_v33 = vpop.permute.xlu0 %2281 }
 0xde6   : > { %v2292_v9 = vsel %vm1852_vm8, %v2282_v33, 0 }
 0xde7   : > { %v2284_v10 = vpop.permute.xlu1 %2283 }
 0xde8   : > { %v2295_v11 = vsel %vm1852_vm8, %v2284_v10, 0  ;;  %v3284_v10 = vld [vmem:[#allocation8] sm:$0xff]  }
 0xde9   : > { %v2278_v12 = vpop.permute.xlu0 %2277 }
 0xdec   : > { %v3300_v17 = vpop.eup %3299 }
 0xded   : > { %v2206_v28 = vsel %vm1908_vm10, %v3300_v17, 0.0 }
 0xdee   : > { %v3302_v6 = vpop.eup %3301 }
 0xdef   : > { %v2212_v8 = vpack.c.bf16 %v3302_v6, %v3300_v17  ;;  %v2209_v31 = vsel %vm1908_vm10, %v3302_v6, 0.0 }
 0xdf1   : > { %3061 = vmatmul.mubr.msk.bf16.vlgmr.msra.gmra.mrb[16].mxu1 %vm1908_vm10, %v2212_v8 }
 0xdf2   : > { %3065 = vmatpush3.bf16.xpose.msra.mxu1 %v2289_v15  ;;  %3070 = vmatprep.mubr.msk.bf16.mxu1 %vm3545_vm4, %v3544_v50 }
 0xdf3   : > { %3066 = vmatprep.subr.bf16.mxu1 %v3544_v50 }
 0xdfa   : > { %3067 = vmatpush3.bf16.xpose.msra.mxu1 %v2292_v9 }
 0xdfb   : > { %3068 = vmatprep.subr.bf16.mxu1 %v3544_v50 }
 0xe02   : > { %3069 = vmatpush3.bf16.xpose.msra.mxu1 %v2295_v11  ;;  %v3285_v11 = vld [vmem:[#allocation8 + $0x8] sm:$0xff]  }
 0xe09   : > { %3071 = vmatmul.mubr.msk.bf16.vlgmr.msra.gmra.mrb[20].mxu1 %vm1852_vm8, %v2278_v12 }
 0xec4   : > { %v4184_v14 = vpop.f32.mrb[16].mxu1 }
 0xec5   : > { %v3062_v16 = vpop.f32.mrb[17].mxu1 }
 0xec6   : > { %v4186_v18 = vpop.f32.mrb[18].mxu1 }
 0xec7   : > { %v3063_v19 = vpop.f32.mrb[19].mxu1 }
 0xedc   : > { %v2331_v20 = vpop.f32.mrb[20].mxu1 }
 0xedd   : > { %v2338_v21 = vsel %vm1850_vm9, %v2331_v20, -1e+30  ;;  %v3072_v22 = vpop.f32.mrb[21].mxu1 }
 0xede   : > { %v2334_v23 = vpop.f32.mrb[22].mxu1  ;;  %v2340_v24 = vsel %vm1908_vm10, %v2338_v21, -inf }
 0xedf   : > { %v2339_v25 = vsel %vm1851_vm11, %v2334_v23, -1e+30  ;;  %2341 = vmax.xlane.f32.xlu1 %v2340_v24  ;;  %v3073_v26 = vpop.f32.mrb[23].mxu1  ;;  %v2491_v24 = vunpack.c.l.bf16 %v3989_v52 }
 0xee0   : > { %v2343_v27 = vsel %vm1908_vm10, %v2339_v25, -inf }
 0xee1   : > { %2344 = vmax.xlane.f32.xlu0 %v2343_v27 }
 0xef0   : > { %2361 = vrot.lane.b32.xlu1 %v4079_v48, %s3549_s20 }
 0xef4   : > { %2363 = vrot.lane.b32.xlu1 %v4083_v49, %s3549_s20 }
 0xef7   : > { %2359 = vrot.lane.b32.xlu0 %v4071_v47, %s3549_s20 }
 0xf16   : > { %2058 = vadd.xlane.f32.xlu0 %v2057_v36  ;;  %v2492_v36 = vunpack.c.h.bf16 %v3989_v52 }
 0xf18   : > { %2061 = vadd.xlane.f32.xlu1 %v2060_v38 }
 0xf1a   : > { %2207 = vadd.xlane.f32.xlu0 %v2206_v28 }
 0xf1e   : > { %2210 = vadd.xlane.f32.xlu0 %v2209_v31 }
 0xf6c   : > { %v2342_v48 = vpop.xlane.xlu1 %2341 }
 0xf6d   : > { %v2346_v32 = vsub.f32 %v2338_v21, %v2342_v48 }
 0xf6e   : > { %v2345_v49 = vpop.xlane.xlu0 %2344 }
 0xf6f   : > { %v2348_v34 = vmul.f32 1.442695, %v2346_v32  ;;  %v2347_v35 = vsub.f32 %v2339_v25, %v2345_v49 }
 0xf70   : > { %v2362_v29 = vpop.permute.xlu1 %2361 }
 0xf71   : > { %3303 = vpow2.f32 %v2348_v34  ;;  %v2350_v47 = vmul.f32 1.442695, %v2347_v35 }
 0xf72   : > { %v2360_v37 = vpop.permute.xlu0 %2359 }
 0xf73   : > { %3305 = vpow2.f32 %v2350_v47  ;;  %3075 = vmatpush3.bf16.msra.mxu0 %v2360_v37 }
 0xf74   : > { %3076 = vmatprep.subr.bf16.mxu0 %v3544_v50  ;;  %v2364_v30 = vpop.permute.xlu1 %2363 }
 0xf77   : > { %3077 = vmatpush3.bf16.msra.mxu0 %v2362_v29 }
 0xf78   : > { %3078 = vmatprep.subr.bf16.mxu0 %v3544_v50 }
 0xf7b   : > { %v3304_v39 = vpop.eup %3303  ;;  %3079 = vmatpush3.bf16.msra.mxu0 %v2364_v30 }
 0xf7c   : > { %v2352_v40 = vsel %vm1908_vm10, %v3304_v39, 0.0  ;;  %3084 = vmatprep.subr.bf16.mxu0 %v3544_v50 }
 0xf7d   : > { %v3306_v41 = vpop.eup %3305  ;;  %2353 = vadd.xlane.f32.xlu1 %v2352_v40 }
 0xf7e   : > { %v2355_v42 = vsel %vm1908_vm10, %v3306_v41, 0.0  ;;  %v2358_v44 = vpack.c.bf16 %v3306_v41, %v3304_v39 }
 0xf7f   : > { %2356 = vadd.xlane.f32.xlu0 %v2355_v42 }
 0xf80   : > { %3081 = vmatmul.mubr.msk.bf16.vlgmr.msra.gmra.mrb[20].mxu0 %vm1908_vm10, %v2358_v44 }
 0xf81   : > { %1922 = vadd.xlane.f32.xlu1 %v1921_v46  ;;  %3088 = vmatprep.mubr.msk.bf16.mxu0 %vm3545_vm4, %v3544_v50 }
 0xf82   : > { %3085 = vmatpush3.bf16.msra.mxu0 %v3284_v10 }
 0xf83   : > { %1925 = vadd.xlane.f32.xlu0 %v1924_v51  ;;  %3086 = vmatprep.subr.bf16.mxu0 %v3544_v50  ;;  %v2764_v50 = vld [vmem:[#allocation10] ss:$0 sm:$0xff] }
 0xf86   : > { %3087 = vmatpush3.bf16.msra.mxu0 %v3285_v11 }
 0xfa3   : > { %v2059_v53 = vpop.xlane.xlu0 %2058 }
 0xfa4   : > { %3307 = vrcp.f32 %v2059_v53 }
 0xfa5   : > { %v2062_v54 = vpop.xlane.xlu1 %2061 }
 0xfa6   : > { %3309 = vrcp.f32 %v2062_v54 }
 0xfa7   : > { %v2208_v55 = vpop.xlane.xlu0 %2207 }
 0xfa8   : > { %3311 = vrcp.f32 %v2208_v55 }
 0xfab   : > { %v2211_v56 = vpop.xlane.xlu0 %2210 }
 0xfac   : > { %3313 = vrcp.f32 %v2211_v56 }
 0xfae   : > { %v3308_v57 = vpop.eup %3307 }
 0xfaf   : > { %v2122_v58 = vmul.f32 %v3308_v57, %v4154_v43 }
 0xfb0   : > { %v3310_v60 = vpop.eup %3309 }
 0xfb1   : > { %v2123_v61 = vmul.f32 %v3310_v60, %v4156_v45 }
 0xfb2   : > { %v3312_v63 = vpop.eup %3311 }
 0xfb3   : > { %v2124_v62 = vpack.c.bf16 %v2123_v61, %v2122_v58  ;;  %v2268_v0 = vmul.f32 %v3312_v63, %v4184_v14 }
 0xfb5   : > { %2126 = vrot.lane.b32.xlu1 %v2124_v62, %s3550_s18 }
 0xfb6   : > { %v3314_v59 = vpop.eup %3313 }
 0xfb7   : > { %v2269_v1 = vmul.f32 %v3314_v59, %v4186_v18 }
 0xfb9   : > { %v2270_v2 = vpack.c.bf16 %v2269_v1, %v2268_v0 }
 0xfbb   : > { %2272 = vrot.lane.b32.xlu0 %v2270_v2, %s3551_s3 }
0x100a   : > { %v2354_v3 = vpop.xlane.xlu1 %2353 }
0x100c   : > { %v2357_v4 = vpop.xlane.xlu0 %2356 }
0x100e   : > { %v1923_v13 = vpop.xlane.xlu1 %1922 }
0x100f   : > { %3315 = vrcp.f32 %v1923_v13 }
0x1010   : > { %v1926_v43 = vpop.xlane.xlu0 %1925 }
0x1011   : > { %3317 = vrcp.f32 %v1926_v43 }
0x1012   : > { %3319 = vrcp.f32 %v2354_v3 }
0x1013   : > { %3321 = vrcp.f32 %v2357_v4 }
0x1019   : > { %v3316_v45 = vpop.eup %3315 }
0x101a   : > { %v1974_v6 = vmul.f32 %v3316_v45, %v4106_v5 }
0x101b   : > { %v3318_v17 = vpop.eup %3317 }
0x101c   : > { %v1975_v15 = vmul.f32 %v3318_v17, %v4108_v7  ;;  %v3320_v7 = vpop.eup %3319 }
0x101d   : > { %v3322_v14 = vpop.eup %3321 }
0x101e   : > { %v1976_v8 = vpack.c.bf16 %v1975_v15, %v1974_v6 }
0x1020   : > { %1977 = vst.msk [vmem:[#allocation4] sm:$0xff] %vm1852_vm8, %v1976_v8 }
0x1027   : > { %v2127_v33 = vpop.permute.xlu1 %2126 }
0x1028   : > { %2130 = vst.msk [vmem:[#allocation4] sm:$0xff] %vm2129_vm12, %v2127_v33 }
0x102d   : > { %v2273_v9 = vpop.permute.xlu0 %2272 }
0x102e   : > { %2276 = vst.msk [vmem:[#allocation4] sm:$0xff] %vm2275_vm13, %v2273_v9 }
0x1053   : > { %v2405_v5 = vpop.f32.mrb[20].mxu0 }
0x1054   : > { %v3082_v12 = vpop.f32.mrb[21].mxu0  ;;  %v2414_v18 = vmul.f32 %v3320_v7, %v2405_v5 }
0x1055   : > { %v2408_v16 = vpop.f32.mrb[22].mxu0 }
0x1056   : > { %v2415_v19 = vmul.f32 %v3322_v14, %v2408_v16  ;;  %v3083_v20 = vpop.f32.mrb[23].mxu0 }
0x1058   : > { %v2416_v21 = vpack.c.bf16 %v2415_v19, %v2414_v18 }
0x105a   : > { %2418 = vrot.lane.b32.xlu1 %v2416_v21, %s3552_s30 }
0x10cc   : > { %v2419_v22 = vpop.permute.xlu1 %2418 }
0x10cd   : > { %2422 = vst.msk [vmem:[#allocation4] sm:$0xff] %vm2421_vm14, %v2419_v22 }
0x10d4   : > { %v2423_v23 = vld [vmem:[#allocation4] sm:$0xff] }
0x10d5   : > { %3089 = vmatmul.mubr.msk.bf16.vlgmr.msra.gmra.mrb[24].mxu0 %vm1417_vm5, %v2423_v23 }
0x11a8   : > { %v2484_v25 = vpop.f32.mrb[24].mxu0 }
0x11a9   : > { %v2485_v26 = vadd.f32 %v2764_v50, %v2484_v25  ;;  %v3090_v27 = vpop.f32.mrb[25].mxu0 }
0x11aa   : > { %v2487_v38 = vpop.f32.mrb[26].mxu0 }
0x11ab   : > { %v2493_v28 = vadd.f32 %v2491_v24, %v2485_v26  ;;  %v2488_v31 = vadd.f32 %v2764_v50, %v2487_v38  ;;  %v3091_v48 = vpop.f32.mrb[27].mxu0 }
0x11ad   : > { %2495 = vst.msk [vmem:[%s3894_s17] sm:$0xff] %vm1417_vm5, %v2493_v28  ;;  %v2494_v32 = vadd.f32 %v2492_v36, %v2488_v31 }
0x11af   : > { %2496 = vst.msk [vmem:[%s3894_s17 + $0x8] sm:$0xff] %vm1417_vm5, %v2494_v32 }
0x11b0   : > { %3422 = shalt.err (!%p3419_p2)
}
0x11b1   : > { %s3423_s17 = scalar_lea.hbm %s4236_s13, 256  ;;  %s3427_s20 = scalar_lea.hbm %s4400_s5, 1024 }
0x11b2   : > { %p3424_p9 = scmp.ne.s32.totalorder %s4236_s13, %s3423_s17  ;;  %p3428_p3 = scmp.lt.u32.totalorder %s4236_s13, %s4400_s5 }
0x11b3   : > { %p3429_p1 = scmp.lt.u32.totalorder %s3427_s20, %s3423_s17  ;;  %p3431_p6 = scmp.lt.u32.totalorder %s3423_s17, %s4236_s13 }
0x11b4   : > { %p3425_p7 = pnand %p3424_p9, %p4402_p13 }
0x11b5   : > { %p3430_p4 = por %p3429_p1, %p3428_p3 }
0x11b6   : > { %p3426_p0 = pneg %p3425_p7 }
0x11b7   : > { %p3432_p10 = por %p3431_p6, %p3430_p4 }
0x11b9   : > { %p3433_p11 = pnand %p3432_p10, %p3426_p0 }
0x11bb   : > { %3436 = shalt.err (!%p3433_p11)
}
0x11bc   : > { %s3554_s8 = smov 128  }
0x11bd   : > { %3134 = dma.vmem_to_hbm [thread:$0]  (%p4402_p13), %s4240_s21, 256, %s4236_s13, %s4246_s19, %s3554_s8, %s3554_s8, %s3550_s18  }
0x11be PF: > { %s4403_s29 = sld [smem:[#allocation15_spill]]  ;;  %s4404_s27 = sld [smem:[#allocation21_spill]] }
0x11bf   : > { %p3156_p5 = scmp.ge.s32.totalorder %s3535_s0, 2 }
0x11c4   : > { %s2528_s12 = sand.u32 1, %s4403_s29   ;;  %p4405_p8 = scmp.ne.s32.totalorder %s4404_s27, 0 }
0x11c5   : > { %s2529_s28 = scalar_lea.sflag [#allocation7], %s2528_s12 }
0x11c6   : > { %p3148_p12 = pnand %p3156_p5, %p4405_p8 }
0x11c8   : > { %3490 = dma.done.wait (!%p3148_p12), %s2529_s28, 256  }
0x11c9   : > { %3492 = vsyncadd (!%p3148_p12), %s2529_s28, 4294967040  ;;  %s33_s0 = sadd.s32 1, %s3535_s0   ;;  %s4406_s24 = sld [smem:[#allocation16_spill]] }
0x11ca   : > { %p30_p2 = scmp.ge.s32.totalorder %s33_s0, 6   ;;  %s4407_s25 = sld [smem:[#allocation17_spill]] }
0x11cb   : > { %s4408_s26 = sld [smem:[#allocation24_spill]]  ;;  %s4409_s27 = sld [smem:[#allocation18_spill]] }
0x11cc   : > { %s4410_s28 = sld [smem:[#allocation19_spill]]  ;;  %s4411_s29 = sld [smem:[#allocation22_spill]] }
0x11cd   : > { %s4412_s30 = sld [smem:[#allocation23_spill]]  ;;  %s4413_s21 = smov %s3499_s22 }
0x11ce   : > { %s4414_s22 = smov %s3503_s23  ;;  %s4415_s23 = smov %s3809_s6 }
0x11cf   :  { %32 = sbr.rel (!%p30_p2) target bundleno = 26 (0x1a), region = 153 }
0x11d6   :  { %2534 = vsyncpa [#allocation6], 1 }
0x11d7   :  { %2536 = vsyncpa [#allocation6 + $0x1], 1 }
0x11d8   :  { %2537 = vsyncpa [#allocation9], 1 }
0x11d9   :  { %2538 = vsyncpa [#allocation7], 1 }
0x11da   :  { %2540 = vsyncpa [#allocation7 + $0x1], 1 }

</bundles_post_ra>
